<compile_context>
chip_gen: v7x
topology: tpu7x:2x2x1
jax: 0.10.0
libtpu: 0.0.40
codegen_flags: <defaults>
</compile_context>

<pallas_src>
import numpy as np
import jax
import jax.numpy as jnp
from jax import lax
from jax.experimental import pallas as pl
from jax.experimental.pallas import tpu as pltpu


# --------------------------------------------------------------------------
# Static network configuration (the concrete net the dynamic builder creates)
# --------------------------------------------------------------------------
B, C, H, W = 2, 4, 16, 16          # input (NCHW)
CPAD = 8                           # input channels zero-padded 4 -> 8 (sublane tile)
OC, KH, KW = 8, 3, 3               # Conv2d(4 -> 8, kernel 3, padding 1)
HP, WP = H + 2, W + 2              # zero-padded spatial extent (18, 18)
PIX1 = HP * WP                     # 324  padded pixels per image
NPIX = B * PIX1                    # 648  flattened padded pixels (lane axis)
HO, WO = H // 2, W // 2            # 8, 8 after MaxPool2d(2)
POOL1 = HO * WO                    # 64   pooled pixels per image
NFEAT = OC * POOL1                 # 512  features after view(-1, 512)
FC1_OUT, FC2_OUT = 32, 10
MAXSHIFT = WP + 1                  # 19   largest |conv-tap shift| in flat layout
YLEN = NPIX + MAXSHIFT             # 667  conv output length (extended for pool shifts)
ALEN = 2 * MAXSHIFT + YLEN         # 705  padded-flat input length (margins both sides)
NTAP = KH * KW                     # 9    conv taps


# --------------------------------------------------------------------------
# Fully fused forward kernel (single invocation, everything resident in VMEM)
# --------------------------------------------------------------------------
def _net_kernel(a_ref, wc_ref, bc_ref, w1_ref, b1_ref, w2_ref, b2_ref,
                o_ref, f_scr):
    # a_ref  : (8, 705)   padded input, lane = MAXSHIFT + b*324 + yp*18 + xp,
    #                     rows 4..7 are zero (channel padding), margins zero
    # wc_ref : (9, 8, 8)  conv weight, wc[t, oc, ic] (ic 4..7 zero), t = ky*3+kx
    # bc_ref : (8, 1)     conv bias
    # w1_ref : (32, 512)  fc1 weight (native out,in)   b1_ref : (1, 32)
    # w2_ref : (10, 32)   fc2 weight (native out,in)   b2_ref : (1, 10)
    # o_ref  : (2, 10)
    # f_scr  : (2, 512)   NCHW-flattened activation (torch .view(-1, 512))

    # ---- Conv2d + bias + ReLU: 9 shift-accumulate MXU matmuls (no im2col) ----
    acc = None
    t = 0
    for dy in (-1, 0, 1):
        for dx in (-1, 0, 1):
            start = MAXSHIFT + dy * WP + dx              # static, in [0, 38]
            part = jnp.dot(wc_ref[t], a_ref[:, start:start + YLEN],
                           preferred_element_type=jnp.float32)
            acc = part if acc is None else acc + part
            t += 1
    # NOTE: the 19 tail columns (and inter-image margins) of y hold cross-row
    # shift garbage; they only feed never-selected pool positions below.
    y = jnp.maximum(acc + bc_ref[...], 0.0)              # (8, 667)

    # ---- MaxPool2d(2) part 1: max over the 4 window corners ----
    mwin = jnp.maximum(
        jnp.maximum(y[:, 0:NPIX], y[:, 1:1 + NPIX]),
        jnp.maximum(y[:, WP:WP + NPIX], y[:, WP + 1:WP + 1 + NPIX]))  # (8, 648)

    # ---- MaxPool2d(2) part 2: per-image one-hot selector built in-kernel ----
    # sel[l, py*8+px] = 1 where l = (2*py+1)*18 + (2*px+1) (window top-left
    # interior corner in padded coords).  No HBM constant, ~20 vregs of VPU work.
    rr = lax.broadcasted_iota(jnp.int32, (PIX1, POOL1), 0)
    cc = lax.broadcasted_iota(jnp.int32, (PIX1, POOL1), 1)
    tgt = (2 * (cc >> 3) + 1) * WP + (2 * (cc & 7) + 1)
    sel = jnp.where(rr == tgt, 1.0, 0.0).astype(jnp.float32)          # (324, 64)

    # ---- pool-select + torch view(-1, 512) NCHW flatten, per image ----
    # flat[b, oc*64 + s] = pooled_b[oc, s]; this is the only sublane->lane
    # permutation in the net (4 KB total), done with 16 small VMEM copies.
    # TODO(synk): if Mosaic gains 2-contracting-dim dot_general support,
    # contract pooled_b (oc,s) directly against fc1_w.reshape(32,8,64) and
    # drop f_scr entirely.
    for b in range(B):
        pooled_b = jnp.dot(mwin[:, b * PIX1:(b + 1) * PIX1], sel,
                           preferred_element_type=jnp.float32)        # (8, 64)
        for oc in range(OC):
            f_scr[b:b + 1, oc * POOL1:(oc + 1) * POOL1] = pooled_b[oc:oc + 1, :]

    # ---- Linear(512->32) + ReLU + Linear(32->10), weights kept (out, in) ----
    nt = (((1,), (1,)), ((), ()))                        # contract last dims (x @ W^T)
    h = lax.dot_general(f_scr[...], w1_ref[...], nt,
                        preferred_element_type=jnp.float32)
    h = jnp.maximum(h + b1_ref[...], 0.0)                # (2, 32)
    out = lax.dot_general(h, w2_ref[...], nt,
                          preferred_element_type=jnp.float32)
    o_ref[...] = out + b2_ref[...]                       # (2, 10)


# --------------------------------------------------------------------------
# One-time parameter preparation (outside the per-call hot path)
# --------------------------------------------------------------------------
def prepare_params(params):
    # conv weight -> (tap, oc, ic) with ic zero-padded 4 -> 8 (matches a_ref rows)
    wc = jnp.transpose(params["conv_w"], (2, 3, 0, 1)).reshape(NTAP, OC, C)
    wc = jnp.pad(wc, ((0, 0), (0, 0), (0, CPAD - C)))
    # fc weights stay in native (out, in) layout; kept f32 (bf16 casting of
    # the constant MXU operands is only worthwhile once batch is scaled).
    return {
        "wc": wc.astype(jnp.float32),                                 # (9, 8, 8)
        "bc": params["conv_b"].reshape(OC, 1).astype(jnp.float32),
        "w1": params["fc1_w"].astype(jnp.float32),                    # (32, 512)
        "b1": params["fc1_b"].reshape(1, FC1_OUT).astype(jnp.float32),
        "w2": params["fc2_w"].astype(jnp.float32),                    # (10, 32)
        "b2": params["fc2_b"].reshape(1, FC2_OUT).astype(jnp.float32),
    }


# --------------------------------------------------------------------------
# Forward pass: tiny input relayout + one fused pallas_call
# --------------------------------------------------------------------------
@jax.jit
def net_forward(x, kp):
    assert x.shape == (B, C, H, W)
    # Channel-padded, spatially zero-padded, flattened input (one fused XLA op).
    xt = jnp.transpose(x, (1, 0, 2, 3))                              # (C, B, H, W)
    xt = jnp.pad(xt, ((0, CPAD - C), (0, 0), (1, 1), (1, 1)))        # (8, B, 18, 18)
    a_ext = jnp.pad(xt.reshape(CPAD, NPIX),
                    ((0, 0), (MAXSHIFT, ALEN - MAXSHIFT - NPIX)))    # (8, 705)

    cost = pl.CostEstimate(
        flops=2 * (NTAP * OC * CPAD * YLEN + B * OC * PIX1 * POOL1
                   + B * NFEAT * FC1_OUT + B * FC1_OUT * FC2_OUT),
        transcendentals=0,
        bytes_accessed=4 * (a_ext.size + kp["wc"].size + kp["bc"].size
                            + kp["w1"].size + kp["b1"].size
                            + kp["w2"].size + kp["b2"].size + B * FC2_OUT),
    )

    # grid=() -> single TensorCore; at B=2 the kernel is launch-latency bound
    # and a batch grid axis (dimension_semantics=("parallel",)) only pays off
    # once the batch is scaled (v7x second core / v6e lane-axis amortization).
    return pl.pallas_call(
        _net_kernel,
        out_shape=jax.ShapeDtypeStruct((B, FC2_OUT), jnp.float32),
        scratch_shapes=[pltpu.VMEM((B, NFEAT), jnp.float32)],        # flatten buffer
        cost_estimate=cost,
    )(a_ext, kp["wc"], kp["bc"], kp["w1"], kp["b1"], kp["w2"], kp["b2"])


# --------------------------------------------------------------------------
# Plain-JAX reference (mirrors the PyTorch module) and parameter init
# --------------------------------------------------------------------------
@jax.jit
def reference_forward(x, params):
    conv = lax.conv_general_dilated(
        x, params["conv_w"], window_strides=(1, 1), padding=((1, 1), (1, 1)),
        dimension_numbers=("NCHW", "OIHW", "NCHW"),
        precision=lax.Precision.HIGHEST)
    conv = jnp.maximum(conv + params["conv_b"][None, :, None, None], 0.0)
    pooled = lax.reduce_window(conv, -jnp.inf, lax.max,
                               (1, 1, 2, 2), (1, 1, 2, 2), "VALID")
    flat = pooled.reshape(x.shape[0], -1)                            # torch .view(-1, 512)
    h = jnp.maximum(jnp.dot(flat, params["fc1_w"].T,
                            precision=lax.Precision.HIGHEST) + params["fc1_b"], 0.0)
    return jnp.dot(h, params["fc2_w"].T,
                   precision=lax.Precision.HIGHEST) + params["fc2_b"]


def init_params(key):
    kc, kcb, k1, k1b, k2, k2b = jax.random.split(key, 6)
    return {
        "conv_w": 0.1 * jax.random.normal(kc, (OC, C, KH, KW), jnp.float32),
        "conv_b": 0.1 * jax.random.normal(kcb, (OC,), jnp.float32),
        "fc1_w": 0.05 * jax.random.normal(k1, (FC1_OUT, NFEAT), jnp.float32),
        "fc1_b": 0.05 * jax.random.normal(k1b, (FC1_OUT,), jnp.float32),
        "fc2_w": 0.1 * jax.random.normal(k2, (FC2_OUT, FC1_OUT), jnp.float32),
        "fc2_b": 0.1 * jax.random.normal(k2b, (FC2_OUT,), jnp.float32),
    }


if __name__ == "__main__":
    key = jax.random.PRNGKey(0)
    kx, kw = jax.random.split(key)
    x = jax.random.normal(kx, (B, C, H, W), jnp.float32)             # NCHW input
    params = init_params(kw)
    kparams = prepare_params(params)                                 # one-time prep

    out = jax.block_until_ready(net_forward(x, kparams))
    assert out.shape == (B, FC2_OUT) and out.dtype == jnp.float32

    ref = jax.block_until_ready(reference_forward(x, params))
    # All-f32 pipeline; 1e-3 is conservative headroom for MXU f32 pass
    # differences while still catching any layout/permutation bug.
    assert np.allclose(np.asarray(out), np.asarray(ref), rtol=1e-3, atol=1e-3), (
        np.max(np.abs(np.asarray(out) - np.asarray(ref))))

    print("KERNEL_OK")
</pallas_src>

<mosaic_0001>
module attributes {stable_mosaic.version = 11 : i64} {
  func.func @_net_kernel(%arg0: memref<8x705xf32, #tpu.memory_space<vmem>>, %arg1: memref<9x8x8xf32, #tpu.memory_space<vmem>>, %arg2: memref<8x1xf32, #tpu.memory_space<vmem>>, %arg3: memref<32x512xf32, #tpu.memory_space<vmem>>, %arg4: memref<1x32xf32, #tpu.memory_space<vmem>>, %arg5: memref<10x32xf32, #tpu.memory_space<vmem>>, %arg6: memref<1x10xf32, #tpu.memory_space<vmem>>, %arg7: memref<2x10xf32, #tpu.memory_space<vmem>>, %arg8: memref<2x512xf32, #tpu.memory_space<vmem>>) attributes {dimension_semantics = [], scalar_prefetch = 0 : i64, scratch_operands = 1 : i64, tpu.core_type = #tpu.core_type<tc>} {
    %c0 = arith.constant 0 : index
    %c0_0 = arith.constant 0 : index
    %c0_1 = arith.constant 0 : index
    %0 = vector.load %arg1[%c0, %c0_0, %c0_1] : memref<9x8x8xf32, #tpu.memory_space<vmem>>, vector<1x8x8xf32>
    %1 = vector.shape_cast %0 : vector<1x8x8xf32> to vector<8x8xf32>
    %c0_2 = arith.constant 0 : index
    %c0_3 = arith.constant 0 : index
    %2 = vector.load %arg0[%c0_2, %c0_3] : memref<8x705xf32, #tpu.memory_space<vmem>>, vector<8x667xf32>
    %cst = arith.constant dense<0.000000e+00> : vector<8x667xf32>
    %3 = tpu.matmul %1, %2, %cst {dimension_numbers = #tpu.dot_dimension_numbers<[1], [0], [0], [1], [0, 0, 1, 1], [], []>} : vector<8x8xf32>, vector<8x667xf32>, vector<8x667xf32> -> vector<8x667xf32>
    %c1 = arith.constant 1 : index
    %c0_4 = arith.constant 0 : index
    %c0_5 = arith.constant 0 : index
    %4 = vector.load %arg1[%c1, %c0_4, %c0_5] : memref<9x8x8xf32, #tpu.memory_space<vmem>>, vector<1x8x8xf32>
    %5 = vector.shape_cast %4 : vector<1x8x8xf32> to vector<8x8xf32>
    %c0_6 = arith.constant 0 : index
    %c1_7 = arith.constant 1 : index
    %6 = vector.load %arg0[%c0_6, %c1_7] : memref<8x705xf32, #tpu.memory_space<vmem>>, vector<8x667xf32>
    %cst_8 = arith.constant dense<0.000000e+00> : vector<8x667xf32>
    %7 = tpu.matmul %5, %6, %cst_8 {dimension_numbers = #tpu.dot_dimension_numbers<[1], [0], [0], [1], [0, 0, 1, 1], [], []>} : vector<8x8xf32>, vector<8x667xf32>, vector<8x667xf32> -> vector<8x667xf32>
    %8 = arith.addf %3, %7 : vector<8x667xf32>
    %c2 = arith.constant 2 : index
    %c0_9 = arith.constant 0 : index
    %c0_10 = arith.constant 0 : index
    %9 = vector.load %arg1[%c2, %c0_9, %c0_10] : memref<9x8x8xf32, #tpu.memory_space<vmem>>, vector<1x8x8xf32>
    %10 = vector.shape_cast %9 : vector<1x8x8xf32> to vector<8x8xf32>
    %c0_11 = arith.constant 0 : index
    %c2_12 = arith.constant 2 : index
    %11 = vector.load %arg0[%c0_11, %c2_12] : memref<8x705xf32, #tpu.memory_space<vmem>>, vector<8x667xf32>
    %cst_13 = arith.constant dense<0.000000e+00> : vector<8x667xf32>
    %12 = tpu.matmul %10, %11, %cst_13 {dimension_numbers = #tpu.dot_dimension_numbers<[1], [0], [0], [1], [0, 0, 1, 1], [], []>} : vector<8x8xf32>, vector<8x667xf32>, vector<8x667xf32> -> vector<8x667xf32>
    %13 = arith.addf %8, %12 : vector<8x667xf32>
    %c3 = arith.constant 3 : index
    %c0_14 = arith.constant 0 : index
    %c0_15 = arith.constant 0 : index
    %14 = vector.load %arg1[%c3, %c0_14, %c0_15] : memref<9x8x8xf32, #tpu.memory_space<vmem>>, vector<1x8x8xf32>
    %15 = vector.shape_cast %14 : vector<1x8x8xf32> to vector<8x8xf32>
    %c0_16 = arith.constant 0 : index
    %c18 = arith.constant 18 : index
    %16 = vector.load %arg0[%c0_16, %c18] : memref<8x705xf32, #tpu.memory_space<vmem>>, vector<8x667xf32>
    %cst_17 = arith.constant dense<0.000000e+00> : vector<8x667xf32>
    %17 = tpu.matmul %15, %16, %cst_17 {dimension_numbers = #tpu.dot_dimension_numbers<[1], [0], [0], [1], [0, 0, 1, 1], [], []>} : vector<8x8xf32>, vector<8x667xf32>, vector<8x667xf32> -> vector<8x667xf32>
    %18 = arith.addf %13, %17 : vector<8x667xf32>
    %c4 = arith.constant 4 : index
    %c0_18 = arith.constant 0 : index
    %c0_19 = arith.constant 0 : index
    %19 = vector.load %arg1[%c4, %c0_18, %c0_19] : memref<9x8x8xf32, #tpu.memory_space<vmem>>, vector<1x8x8xf32>
    %20 = vector.shape_cast %19 : vector<1x8x8xf32> to vector<8x8xf32>
    %c0_20 = arith.constant 0 : index
    %c19 = arith.constant 19 : index
    %21 = vector.load %arg0[%c0_20, %c19] : memref<8x705xf32, #tpu.memory_space<vmem>>, vector<8x667xf32>
    %cst_21 = arith.constant dense<0.000000e+00> : vector<8x667xf32>
    %22 = tpu.matmul %20, %21, %cst_21 {dimension_numbers = #tpu.dot_dimension_numbers<[1], [0], [0], [1], [0, 0, 1, 1], [], []>} : vector<8x8xf32>, vector<8x667xf32>, vector<8x667xf32> -> vector<8x667xf32>
    %23 = arith.addf %18, %22 : vector<8x667xf32>
    %c5 = arith.constant 5 : index
    %c0_22 = arith.constant 0 : index
    %c0_23 = arith.constant 0 : index
    %24 = vector.load %arg1[%c5, %c0_22, %c0_23] : memref<9x8x8xf32, #tpu.memory_space<vmem>>, vector<1x8x8xf32>
    %25 = vector.shape_cast %24 : vector<1x8x8xf32> to vector<8x8xf32>
    %c0_24 = arith.constant 0 : index
    %c20 = arith.constant 20 : index
    %26 = vector.load %arg0[%c0_24, %c20] : memref<8x705xf32, #tpu.memory_space<vmem>>, vector<8x667xf32>
    %cst_25 = arith.constant dense<0.000000e+00> : vector<8x667xf32>
    %27 = tpu.matmul %25, %26, %cst_25 {dimension_numbers = #tpu.dot_dimension_numbers<[1], [0], [0], [1], [0, 0, 1, 1], [], []>} : vector<8x8xf32>, vector<8x667xf32>, vector<8x667xf32> -> vector<8x667xf32>
    %28 = arith.addf %23, %27 : vector<8x667xf32>
    %c6 = arith.constant 6 : index
    %c0_26 = arith.constant 0 : index
    %c0_27 = arith.constant 0 : index
    %29 = vector.load %arg1[%c6, %c0_26, %c0_27] : memref<9x8x8xf32, #tpu.memory_space<vmem>>, vector<1x8x8xf32>
    %30 = vector.shape_cast %29 : vector<1x8x8xf32> to vector<8x8xf32>
    %c0_28 = arith.constant 0 : index
    %c36 = arith.constant 36 : index
    %31 = vector.load %arg0[%c0_28, %c36] : memref<8x705xf32, #tpu.memory_space<vmem>>, vector<8x667xf32>
    %cst_29 = arith.constant dense<0.000000e+00> : vector<8x667xf32>
    %32 = tpu.matmul %30, %31, %cst_29 {dimension_numbers = #tpu.dot_dimension_numbers<[1], [0], [0], [1], [0, 0, 1, 1], [], []>} : vector<8x8xf32>, vector<8x667xf32>, vector<8x667xf32> -> vector<8x667xf32>
    %33 = arith.addf %28, %32 : vector<8x667xf32>
    %c7 = arith.constant 7 : index
    %c0_30 = arith.constant 0 : index
    %c0_31 = arith.constant 0 : index
    %34 = vector.load %arg1[%c7, %c0_30, %c0_31] : memref<9x8x8xf32, #tpu.memory_space<vmem>>, vector<1x8x8xf32>
    %35 = vector.shape_cast %34 : vector<1x8x8xf32> to vector<8x8xf32>
    %c0_32 = arith.constant 0 : index
    %c37 = arith.constant 37 : index
    %36 = vector.load %arg0[%c0_32, %c37] : memref<8x705xf32, #tpu.memory_space<vmem>>, vector<8x667xf32>
    %cst_33 = arith.constant dense<0.000000e+00> : vector<8x667xf32>
    %37 = tpu.matmul %35, %36, %cst_33 {dimension_numbers = #tpu.dot_dimension_numbers<[1], [0], [0], [1], [0, 0, 1, 1], [], []>} : vector<8x8xf32>, vector<8x667xf32>, vector<8x667xf32> -> vector<8x667xf32>
    %38 = arith.addf %33, %37 : vector<8x667xf32>
    %c8 = arith.constant 8 : index
    %c0_34 = arith.constant 0 : index
    %c0_35 = arith.constant 0 : index
    %39 = vector.load %arg1[%c8, %c0_34, %c0_35] : memref<9x8x8xf32, #tpu.memory_space<vmem>>, vector<1x8x8xf32>
    %40 = vector.shape_cast %39 : vector<1x8x8xf32> to vector<8x8xf32>
    %c0_36 = arith.constant 0 : index
    %c38 = arith.constant 38 : index
    %41 = vector.load %arg0[%c0_36, %c38] : memref<8x705xf32, #tpu.memory_space<vmem>>, vector<8x667xf32>
    %cst_37 = arith.constant dense<0.000000e+00> : vector<8x667xf32>
    %42 = tpu.matmul %40, %41, %cst_37 {dimension_numbers = #tpu.dot_dimension_numbers<[1], [0], [0], [1], [0, 0, 1, 1], [], []>} : vector<8x8xf32>, vector<8x667xf32>, vector<8x667xf32> -> vector<8x667xf32>
    %43 = arith.addf %38, %42 : vector<8x667xf32>
    %c0_38 = arith.constant 0 : index
    %c0_39 = arith.constant 0 : index
    %44 = vector.load %arg2[%c0_38, %c0_39] : memref<8x1xf32, #tpu.memory_space<vmem>>, vector<8x1xf32>
    %45 = vector.broadcast %44 : vector<8x1xf32> to vector<8x667xf32>
    %46 = arith.addf %43, %45 : vector<8x667xf32>
    %cst_40 = arith.constant 0.000000e+00 : f32
    %47 = vector.broadcast %cst_40 : f32 to vector<8x667xf32>
    %48 = arith.maximumf %46, %47 : vector<8x667xf32>
    %49 = vector.extract_strided_slice %48 {offsets = [0, 0], sizes = [8, 648], strides = [1, 1]} : vector<8x667xf32> to vector<8x648xf32>
    %50 = vector.extract_strided_slice %48 {offsets = [0, 1], sizes = [8, 648], strides = [1, 1]} : vector<8x667xf32> to vector<8x648xf32>
    %51 = arith.maximumf %49, %50 : vector<8x648xf32>
    %52 = vector.extract_strided_slice %48 {offsets = [0, 18], sizes = [8, 648], strides = [1, 1]} : vector<8x667xf32> to vector<8x648xf32>
    %53 = vector.extract_strided_slice %48 {offsets = [0, 19], sizes = [8, 648], strides = [1, 1]} : vector<8x667xf32> to vector<8x648xf32>
    %54 = arith.maximumf %52, %53 : vector<8x648xf32>
    %55 = arith.maximumf %51, %54 : vector<8x648xf32>
    %56 = tpu.iota {dimensions = array<i32: 0>} : vector<324x64xi32>
    %57 = tpu.iota {dimensions = array<i32: 1>} : vector<324x64xi32>
    %c3_i32 = arith.constant 3 : i32
    %58 = vector.broadcast %c3_i32 : i32 to vector<324x64xi32>
    %59 = arith.shrsi %57, %58 : vector<324x64xi32>
    %c2_i32 = arith.constant 2 : i32
    %60 = vector.broadcast %c2_i32 : i32 to vector<324x64xi32>
    %61 = arith.muli %60, %59 : vector<324x64xi32>
    %c1_i32 = arith.constant 1 : i32
    %62 = vector.broadcast %c1_i32 : i32 to vector<324x64xi32>
    %63 = arith.addi %61, %62 : vector<324x64xi32>
    %c18_i32 = arith.constant 18 : i32
    %64 = vector.broadcast %c18_i32 : i32 to vector<324x64xi32>
    %65 = arith.muli %63, %64 : vector<324x64xi32>
    %c7_i32 = arith.constant 7 : i32
    %66 = vector.broadcast %c7_i32 : i32 to vector<324x64xi32>
    %67 = arith.andi %57, %66 : vector<324x64xi32>
    %c2_i32_41 = arith.constant 2 : i32
    %68 = vector.broadcast %c2_i32_41 : i32 to vector<324x64xi32>
    %69 = arith.muli %68, %67 : vector<324x64xi32>
    %c1_i32_42 = arith.constant 1 : i32
    %70 = vector.broadcast %c1_i32_42 : i32 to vector<324x64xi32>
    %71 = arith.addi %69, %70 : vector<324x64xi32>
    %72 = arith.addi %65, %71 : vector<324x64xi32>
    %73 = arith.cmpi eq, %56, %72 : vector<324x64xi32>
    %cst_43 = arith.constant 1.000000e+00 : f32
    %cst_44 = arith.constant 0.000000e+00 : f32
    %74 = vector.broadcast %cst_43 : f32 to vector<324x64xf32>
    %75 = vector.broadcast %cst_44 : f32 to vector<324x64xf32>
    %76 = arith.select %73, %74, %75 : vector<324x64xi1>, vector<324x64xf32>
    %77 = vector.extract_strided_slice %55 {offsets = [0, 0], sizes = [8, 324], strides = [1, 1]} : vector<8x648xf32> to vector<8x324xf32>
    %cst_45 = arith.constant dense<0.000000e+00> : vector<8x64xf32>
    %78 = tpu.matmul %77, %76, %cst_45 {dimension_numbers = #tpu.dot_dimension_numbers<[1], [0], [0], [1], [0, 0, 1, 1], [], []>} : vector<8x324xf32>, vector<324x64xf32>, vector<8x64xf32> -> vector<8x64xf32>
    %79 = vector.extract_strided_slice %78 {offsets = [0, 0], sizes = [1, 64], strides = [1, 1]} : vector<8x64xf32> to vector<1x64xf32>
    %c0_46 = arith.constant 0 : index
    %c0_47 = arith.constant 0 : index
    %80 = vector.load %arg8[%c0_46, %c0_47] : memref<2x512xf32, #tpu.memory_space<vmem>>, vector<1x64xf32>
    tpu.vector_store %arg8[%c0_46, %c0_47], %79 {strides = array<i32>} : memref<2x512xf32, #tpu.memory_space<vmem>>, vector<1x64xf32>,
    %81 = vector.extract_strided_slice %78 {offsets = [1, 0], sizes = [1, 64], strides = [1, 1]} : vector<8x64xf32> to vector<1x64xf32>
    %c0_48 = arith.constant 0 : index
    %c64 = arith.constant 64 : index
    %82 = vector.load %arg8[%c0_48, %c64] : memref<2x512xf32, #tpu.memory_space<vmem>>, vector<1x64xf32>
    tpu.vector_store %arg8[%c0_48, %c64], %81 {strides = array<i32>} : memref<2x512xf32, #tpu.memory_space<vmem>>, vector<1x64xf32>,
    %83 = vector.extract_strided_slice %78 {offsets = [2, 0], sizes = [1, 64], strides = [1, 1]} : vector<8x64xf32> to vector<1x64xf32>
    %c0_49 = arith.constant 0 : index
    %c128 = arith.constant 128 : index
    %84 = vector.load %arg8[%c0_49, %c128] : memref<2x512xf32, #tpu.memory_space<vmem>>, vector<1x64xf32>
    tpu.vector_store %arg8[%c0_49, %c128], %83 {strides = array<i32>} : memref<2x512xf32, #tpu.memory_space<vmem>>, vector<1x64xf32>,
    %85 = vector.extract_strided_slice %78 {offsets = [3, 0], sizes = [1, 64], strides = [1, 1]} : vector<8x64xf32> to vector<1x64xf32>
    %c0_50 = arith.constant 0 : index
    %c192 = arith.constant 192 : index
    %86 = vector.load %arg8[%c0_50, %c192] : memref<2x512xf32, #tpu.memory_space<vmem>>, vector<1x64xf32>
    tpu.vector_store %arg8[%c0_50, %c192], %85 {strides = array<i32>} : memref<2x512xf32, #tpu.memory_space<vmem>>, vector<1x64xf32>,
    %87 = vector.extract_strided_slice %78 {offsets = [4, 0], sizes = [1, 64], strides = [1, 1]} : vector<8x64xf32> to vector<1x64xf32>
    %c0_51 = arith.constant 0 : index
    %c256 = arith.constant 256 : index
    %88 = vector.load %arg8[%c0_51, %c256] : memref<2x512xf32, #tpu.memory_space<vmem>>, vector<1x64xf32>
    tpu.vector_store %arg8[%c0_51, %c256], %87 {strides = array<i32>} : memref<2x512xf32, #tpu.memory_space<vmem>>, vector<1x64xf32>,
    %89 = vector.extract_strided_slice %78 {offsets = [5, 0], sizes = [1, 64], strides = [1, 1]} : vector<8x64xf32> to vector<1x64xf32>
    %c0_52 = arith.constant 0 : index
    %c320 = arith.constant 320 : index
    %90 = vector.load %arg8[%c0_52, %c320] : memref<2x512xf32, #tpu.memory_space<vmem>>, vector<1x64xf32>
    tpu.vector_store %arg8[%c0_52, %c320], %89 {strides = array<i32>} : memref<2x512xf32, #tpu.memory_space<vmem>>, vector<1x64xf32>,
    %91 = vector.extract_strided_slice %78 {offsets = [6, 0], sizes = [1, 64], strides = [1, 1]} : vector<8x64xf32> to vector<1x64xf32>
    %c0_53 = arith.constant 0 : index
    %c384 = arith.constant 384 : index
    %92 = vector.load %arg8[%c0_53, %c384] : memref<2x512xf32, #tpu.memory_space<vmem>>, vector<1x64xf32>
    tpu.vector_store %arg8[%c0_53, %c384], %91 {strides = array<i32>} : memref<2x512xf32, #tpu.memory_space<vmem>>, vector<1x64xf32>,
    %93 = vector.extract_strided_slice %78 {offsets = [7, 0], sizes = [1, 64], strides = [1, 1]} : vector<8x64xf32> to vector<1x64xf32>
    %c0_54 = arith.constant 0 : index
    %c448 = arith.constant 448 : index
    %94 = vector.load %arg8[%c0_54, %c448] : memref<2x512xf32, #tpu.memory_space<vmem>>, vector<1x64xf32>
    tpu.vector_store %arg8[%c0_54, %c448], %93 {strides = array<i32>} : memref<2x512xf32, #tpu.memory_space<vmem>>, vector<1x64xf32>,
    %95 = vector.extract_strided_slice %55 {offsets = [0, 324], sizes = [8, 324], strides = [1, 1]} : vector<8x648xf32> to vector<8x324xf32>
    %cst_55 = arith.constant dense<0.000000e+00> : vector<8x64xf32>
    %96 = tpu.matmul %95, %76, %cst_55 {dimension_numbers = #tpu.dot_dimension_numbers<[1], [0], [0], [1], [0, 0, 1, 1], [], []>} : vector<8x324xf32>, vector<324x64xf32>, vector<8x64xf32> -> vector<8x64xf32>
    %97 = vector.extract_strided_slice %96 {offsets = [0, 0], sizes = [1, 64], strides = [1, 1]} : vector<8x64xf32> to vector<1x64xf32>
    %c1_56 = arith.constant 1 : index
    %c0_57 = arith.constant 0 : index
    %98 = vector.load %arg8[%c1_56, %c0_57] : memref<2x512xf32, #tpu.memory_space<vmem>>, vector<1x64xf32>
    tpu.vector_store %arg8[%c1_56, %c0_57], %97 {strides = array<i32>} : memref<2x512xf32, #tpu.memory_space<vmem>>, vector<1x64xf32>,
    %99 = vector.extract_strided_slice %96 {offsets = [1, 0], sizes = [1, 64], strides = [1, 1]} : vector<8x64xf32> to vector<1x64xf32>
    %c1_58 = arith.constant 1 : index
    %c64_59 = arith.constant 64 : index
    %100 = vector.load %arg8[%c1_58, %c64_59] : memref<2x512xf32, #tpu.memory_space<vmem>>, vector<1x64xf32>
    tpu.vector_store %arg8[%c1_58, %c64_59], %99 {strides = array<i32>} : memref<2x512xf32, #tpu.memory_space<vmem>>, vector<1x64xf32>,
    %101 = vector.extract_strided_slice %96 {offsets = [2, 0], sizes = [1, 64], strides = [1, 1]} : vector<8x64xf32> to vector<1x64xf32>
    %c1_60 = arith.constant 1 : index
    %c128_61 = arith.constant 128 : index
    %102 = vector.load %arg8[%c1_60, %c128_61] : memref<2x512xf32, #tpu.memory_space<vmem>>, vector<1x64xf32>
    tpu.vector_store %arg8[%c1_60, %c128_61], %101 {strides = array<i32>} : memref<2x512xf32, #tpu.memory_space<vmem>>, vector<1x64xf32>,
    %103 = vector.extract_strided_slice %96 {offsets = [3, 0], sizes = [1, 64], strides = [1, 1]} : vector<8x64xf32> to vector<1x64xf32>
    %c1_62 = arith.constant 1 : index
    %c192_63 = arith.constant 192 : index
    %104 = vector.load %arg8[%c1_62, %c192_63] : memref<2x512xf32, #tpu.memory_space<vmem>>, vector<1x64xf32>
    tpu.vector_store %arg8[%c1_62, %c192_63], %103 {strides = array<i32>} : memref<2x512xf32, #tpu.memory_space<vmem>>, vector<1x64xf32>,
    %105 = vector.extract_strided_slice %96 {offsets = [4, 0], sizes = [1, 64], strides = [1, 1]} : vector<8x64xf32> to vector<1x64xf32>
    %c1_64 = arith.constant 1 : index
    %c256_65 = arith.constant 256 : index
    %106 = vector.load %arg8[%c1_64, %c256_65] : memref<2x512xf32, #tpu.memory_space<vmem>>, vector<1x64xf32>
    tpu.vector_store %arg8[%c1_64, %c256_65], %105 {strides = array<i32>} : memref<2x512xf32, #tpu.memory_space<vmem>>, vector<1x64xf32>,
    %107 = vector.extract_strided_slice %96 {offsets = [5, 0], sizes = [1, 64], strides = [1, 1]} : vector<8x64xf32> to vector<1x64xf32>
    %c1_66 = arith.constant 1 : index
    %c320_67 = arith.constant 320 : index
    %108 = vector.load %arg8[%c1_66, %c320_67] : memref<2x512xf32, #tpu.memory_space<vmem>>, vector<1x64xf32>
    tpu.vector_store %arg8[%c1_66, %c320_67], %107 {strides = array<i32>} : memref<2x512xf32, #tpu.memory_space<vmem>>, vector<1x64xf32>,
    %109 = vector.extract_strided_slice %96 {offsets = [6, 0], sizes = [1, 64], strides = [1, 1]} : vector<8x64xf32> to vector<1x64xf32>
    %c1_68 = arith.constant 1 : index
    %c384_69 = arith.constant 384 : index
    %110 = vector.load %arg8[%c1_68, %c384_69] : memref<2x512xf32, #tpu.memory_space<vmem>>, vector<1x64xf32>
    tpu.vector_store %arg8[%c1_68, %c384_69], %109 {strides = array<i32>} : memref<2x512xf32, #tpu.memory_space<vmem>>, vector<1x64xf32>,
    %111 = vector.extract_strided_slice %96 {offsets = [7, 0], sizes = [1, 64], strides = [1, 1]} : vector<8x64xf32> to vector<1x64xf32>
    %c1_70 = arith.constant 1 : index
    %c448_71 = arith.constant 448 : index
    %112 = vector.load %arg8[%c1_70, %c448_71] : memref<2x512xf32, #tpu.memory_space<vmem>>, vector<1x64xf32>
    tpu.vector_store %arg8[%c1_70, %c448_71], %111 {strides = array<i32>} : memref<2x512xf32, #tpu.memory_space<vmem>>, vector<1x64xf32>,
    %c0_72 = arith.constant 0 : index
    %c0_73 = arith.constant 0 : index
    %113 = vector.load %arg8[%c0_72, %c0_73] : memref<2x512xf32, #tpu.memory_space<vmem>>, vector<2x512xf32>
    %c0_74 = arith.constant 0 : index
    %c0_75 = arith.constant 0 : index
    %114 = vector.load %arg3[%c0_74, %c0_75] : memref<32x512xf32, #tpu.memory_space<vmem>>, vector<32x512xf32>
    %cst_76 = arith.constant dense<0.000000e+00> : vector<2x32xf32>
    %115 = tpu.matmul %113, %114, %cst_76 {dimension_numbers = #tpu.dot_dimension_numbers<[1], [1], [0], [0], [0, 0, 1, 0], [], []>} : vector<2x512xf32>, vector<32x512xf32>, vector<2x32xf32> -> vector<2x32xf32>
    %c0_77 = arith.constant 0 : index
    %c0_78 = arith.constant 0 : index
    %116 = vector.load %arg4[%c0_77, %c0_78] : memref<1x32xf32, #tpu.memory_space<vmem>>, vector<1x32xf32>
    %117 = vector.broadcast %116 : vector<1x32xf32> to vector<2x32xf32>
    %118 = arith.addf %115, %117 : vector<2x32xf32>
    %cst_79 = arith.constant 0.000000e+00 : f32
    %119 = vector.broadcast %cst_79 : f32 to vector<2x32xf32>
    %120 = arith.maximumf %118, %119 : vector<2x32xf32>
    %c0_80 = arith.constant 0 : index
    %c0_81 = arith.constant 0 : index
    %121 = vector.load %arg5[%c0_80, %c0_81] : memref<10x32xf32, #tpu.memory_space<vmem>>, vector<10x32xf32>
    %cst_82 = arith.constant dense<0.000000e+00> : vector<2x10xf32>
    %122 = tpu.matmul %120, %121, %cst_82 {dimension_numbers = #tpu.dot_dimension_numbers<[1], [1], [0], [0], [0, 0, 1, 0], [], []>} : vector<2x32xf32>, vector<10x32xf32>, vector<2x10xf32> -> vector<2x10xf32>
    %c0_83 = arith.constant 0 : index
    %c0_84 = arith.constant 0 : index
    %123 = vector.load %arg6[%c0_83, %c0_84] : memref<1x10xf32, #tpu.memory_space<vmem>>, vector<1x10xf32>
    %124 = vector.broadcast %123 : vector<1x10xf32> to vector<2x10xf32>
    %125 = arith.addf %122, %124 : vector<2x10xf32>
    %c0_85 = arith.constant 0 : index
    %c0_86 = arith.constant 0 : index
    %126 = vector.load %arg7[%c0_85, %c0_86] : memref<2x10xf32, #tpu.memory_space<vmem>>, vector<2x10xf32>
    tpu.vector_store %arg7[%c0_85, %c0_86], %125 {strides = array<i32>} : memref<2x10xf32, #tpu.memory_space<vmem>>, vector<2x10xf32>,
    return
  }
}

</mosaic_0001>

<bundles_post_ra>
// kernel: net_forward.1
= control target key start
LH: loop header
LB: loop body
LE: loop exit
PB: predicated region body
PF: predicated region fallthrough
CT: control target
= control target key end

     0   :  { %s3646_s28 = smov 127   ;;  %v3647_v4 = vmov 0.0   ;;  %s4310_s0 = inlined_call_operand.vmem [shape: f32[8,705], index: 0, kind: input, shape index: {}]   ;;  %s4311_s1 = inlined_call_operand.vmem [shape: f32[9,8,8], index: 1, kind: input, shape index: {}]   ;;  %s4312_s2 = inlined_call_operand.vmem [shape: f32[8,1], index: 2, kind: input, shape index: {}]   ;;  %s4313_s3 = inlined_call_operand.vmem [shape: f32[32,512], index: 3, kind: input, shape index: {}]   ;;  %s4314_s4 = inlined_call_operand.vmem [shape: f32[1,32], index: 4, kind: input, shape index: {}]   ;;  %s4315_s5 = inlined_call_operand.vmem [shape: f32[10,32], index: 5, kind: input, shape index: {}]   ;;  %s4316_s6 = inlined_call_operand.vmem [shape: f32[1,10], index: 6, kind: input, shape index: {}]   ;;  %s4317_s7 = inlined_call_operand.hbm [shape: f32[2,10], index: 7, kind: output, shape index: {}]  }
   0x1   :  { %v3706_v0 = vld [vmem:[%s4310_s0 + $0x8] sm:$0xff]  ;;  %v3711_v1 = vld [vmem:[%s4310_s0] sm:$0xff]  ;;  %v3720_v2 = vld [vmem:[%s4310_s0 + $0x18] sm:$0xff]  ;;  %134 = vmatprep.mubr.f32.mxu0 %v3647_v4  ;;  %421 = vmatprep.mubr.f32.mxu1 %v3647_v4 }
   0x2   :  { %44 = vrot.lane.b32.xlu0 %v3706_v0, %s3646_s28  ;;  %42 = vrot.lane.b32.xlu1 %v3711_v1, %s3646_s28  ;;  %v30_v3 = vld [vmem:[%s4310_s0 + $0x10] sm:$0xff] }
   0x3   :  { %357 = vmatprep.subr.mxu1 %v3720_v2 }
   0x4   :  { %358 = vmatpush1.msra.mxu1 %v30_v3 }
   0x5   :  { %12 = vsyncpa [#allocation4], 0  ;;  %v3734_v5 = vld [vmem:[%s4310_s0 + $0x20] sm:$0xff]  ;;  %v3739_v6 = vld [vmem:[%s4310_s0 + $0x28] sm:$0xff]  ;;  %vm66_vm0 = vcmask 64512   ;;  %s3648_s16 = smov 126  }
   0x6   :  { %46 = vrot.lane.b32.xlu0 %v30_v3, %s3646_s28  ;;  %48 = vrot.lane.b32.xlu1 %v3720_v2, %s3646_s28  ;;  %v3744_v7 = vld [vmem:[%s4311_s1] sm:$0xff]  ;;  %s3649_s0 = smov 110   ;;  %s3650_s17 = smov 109   ;;  %v3654_v8 = vmov 0   ;;  %vm54_vm1 = vcmask 1039360   ;;  %v3156_v15 = vld [vmem:[%s4311_s1 + $0x8] sm:$0xff] }
   0x7   :  { %3161 = vmatmul.mubr.msk.f32.vlgmr.msra.gmra.mrb[0].mxu1 %vm66_vm0, %v3744_v7  ;;  %s3651_s18 = smov 108   ;;  %s3652_s19 = smov 92   ;;  %3605 = vset.pattern.permute.xlu0 %v3654_v8  ;;  %v2235_v9 = vld [vmem:[%s4312_s2] sm:$0xff]  ;;  %vm513_vm2 = vcmask 1031168   ;;  %v3163_v31 = vld [vmem:[%s4311_s1 + $0x10] sm:$0xff]  ;;  %vm761_vm3 = vcmask 900096  }
   0x8   :  { %663 = vmatprep.mubr.f32.mxu1 %v3647_v4  ;;  %s3653_s20 = smov 91   ;;  %s3655_s21 = smov 90   ;;  %v3167_v43 = vld [vmem:[%s4311_s1 + $0x18] sm:$0xff]  ;;  %vm1009_vm4 = vcmask 891904   ;;  %v3171_v52 = vld [vmem:[%s4311_s1 + $0x20] sm:$0xff]  ;;  %vm1257_vm5 = vcmask 883712  }
   0x9   :  { %v3175_v63 = vld [vmem:[%s4311_s1 + $0x28] sm:$0xff]  ;;  %vm1505_vm6 = vcmask 752640   ;;  %vm1753_vm7 = vcmask 744448   ;;  %vm2001_vm8 = vcmask 736256  }
   0xa   :  { %50 = vrot.lane.b32.xlu0 %v3734_v5, %s3646_s28  ;;  %52 = vrot.lane.b32.xlu1 %v3739_v6, %s3646_s28 }
   0xe   :  { %503 = vrot.lane.b32.xlu0 %v3706_v0, %s3648_s16  ;;  %505 = vrot.lane.b32.xlu1 %v30_v3, %s3648_s16 }
  0x12   :  { %501 = vrot.lane.b32.xlu0 %v3711_v1, %s3648_s16  ;;  %507 = vrot.lane.b32.xlu1 %v3720_v2, %s3648_s16 }
  0x16   :  { %509 = vrot.lane.b32.xlu0 %v3734_v5, %s3648_s16  ;;  %511 = vrot.lane.b32.xlu1 %v3739_v6, %s3648_s16 }
  0x1a   :  { %751 = vrot.lane.b32.xlu0 %v3706_v0, %s3649_s0  ;;  %753 = vrot.lane.b32.xlu1 %v30_v3, %s3649_s0 }
  0x1e   :  { %749 = vrot.lane.b32.xlu0 %v3711_v1, %s3649_s0  ;;  %755 = vrot.lane.b32.xlu1 %v3720_v2, %s3649_s0 }
  0x22   :  { %757 = vrot.lane.b32.xlu0 %v3734_v5, %s3649_s0  ;;  %759 = vrot.lane.b32.xlu1 %v3739_v6, %s3649_s0 }
  0x26   :  { %999 = vrot.lane.b32.xlu0 %v3706_v0, %s3650_s17  ;;  %1001 = vrot.lane.b32.xlu1 %v30_v3, %s3650_s17 }
  0x2a   :  { %997 = vrot.lane.b32.xlu0 %v3711_v1, %s3650_s17  ;;  %1003 = vrot.lane.b32.xlu1 %v3720_v2, %s3650_s17 }
  0x2e   :  { %1005 = vrot.lane.b32.xlu0 %v3734_v5, %s3650_s17  ;;  %1007 = vrot.lane.b32.xlu1 %v3739_v6, %s3650_s17 }
  0x32   :  { %1247 = vrot.lane.b32.xlu0 %v3706_v0, %s3651_s18  ;;  %1249 = vrot.lane.b32.xlu1 %v30_v3, %s3651_s18 }
  0x36   :  { %1245 = vrot.lane.b32.xlu0 %v3711_v1, %s3651_s18  ;;  %1251 = vrot.lane.b32.xlu1 %v3720_v2, %s3651_s18 }
  0x3a   :  { %1253 = vrot.lane.b32.xlu0 %v3734_v5, %s3651_s18  ;;  %1255 = vrot.lane.b32.xlu1 %v3739_v6, %s3651_s18 }
  0x3e   :  { %1495 = vrot.lane.b32.xlu0 %v3706_v0, %s3652_s19  ;;  %1497 = vrot.lane.b32.xlu1 %v30_v3, %s3652_s19 }
  0x42   :  { %1493 = vrot.lane.b32.xlu0 %v3711_v1, %s3652_s19  ;;  %1499 = vrot.lane.b32.xlu1 %v3720_v2, %s3652_s19 }
  0x46   :  { %1501 = vrot.lane.b32.xlu0 %v3734_v5, %s3652_s19  ;;  %1503 = vrot.lane.b32.xlu1 %v3739_v6, %s3652_s19 }
  0x4a   :  { %1743 = vrot.lane.b32.xlu0 %v3706_v0, %s3653_s20  ;;  %1745 = vrot.lane.b32.xlu1 %v30_v3, %s3653_s20 }
  0x4e   :  { %1741 = vrot.lane.b32.xlu0 %v3711_v1, %s3653_s20  ;;  %1747 = vrot.lane.b32.xlu1 %v3720_v2, %s3653_s20 }
  0x52   :  { %1749 = vrot.lane.b32.xlu0 %v3734_v5, %s3653_s20  ;;  %1751 = vrot.lane.b32.xlu1 %v3739_v6, %s3653_s20 }
  0x56   :  { %1991 = vrot.lane.b32.xlu0 %v3706_v0, %s3655_s21  ;;  %1993 = vrot.lane.b32.xlu1 %v30_v3, %s3655_s21 }
  0x5a   :  { %1989 = vrot.lane.b32.xlu0 %v3711_v1, %s3655_s21  ;;  %1995 = vrot.lane.b32.xlu1 %v3720_v2, %s3655_s21 }
  0x5e   :  { %1997 = vrot.lane.b32.xlu0 %v3734_v5, %s3655_s21  ;;  %1999 = vrot.lane.b32.xlu1 %v3739_v6, %s3655_s21 }
  0x62   :  { %2238 = vperm.xlu0 %3605, %v2235_v9  }
  0x74   :  { %v45_v10 = vpop.permute.xlu0 %44  ;;  %v43_v11 = vpop.permute.xlu1 %42 }
  0x75   :  { %v55_v16 = vsel %vm54_vm1, %v43_v11, %v45_v10 }
  0x78   :  { %v47_v12 = vpop.permute.xlu0 %46  ;;  %v49_v13 = vpop.permute.xlu1 %48 }
  0x79   :  { %v56_v14 = vsel %vm54_vm1, %v45_v10, %v47_v12  ;;  %v57_v20 = vsel %vm54_vm1, %v47_v12, %v49_v13  ;;  %v3179_v12 = vld [vmem:[%s4311_s1 + $0x30] sm:$0xff] }
  0x7a   :  { %70 = vmatprep.subr.mxu0 %v56_v14 }
  0x7b   :  { %71 = vmatpush1.msra.mxu0 %v55_v16 }
  0x7c   :  { %v51_v17 = vpop.permute.xlu0 %50  ;;  %3157 = vmatmul.mubr.msk.f32.vlgmr.msra.gmra.mrb[0].mxu0 %vm66_vm0, %v3156_v15  ;;  %v53_v18 = vpop.permute.xlu1 %52 }
  0x7d   :  { %v58_v19 = vsel %vm54_vm1, %v49_v13, %v51_v17  ;;  %205 = vmatprep.mubr.f32.mxu0 %v3647_v4  ;;  %v59_v21 = vsel %vm54_vm1, %v51_v17, %v53_v18 }
  0x7e   :  { %141 = vmatprep.subr.mxu0 %v58_v19 }
  0x7f   :  { %142 = vmatpush1.msra.mxu0 %v57_v20 }
  0x80   :  { %v504_v22 = vpop.permute.xlu0 %503  ;;  %3158 = vmatmul.mubr.msk.f32.vlgmr.msra.gmra.mrb[2].mxu0 %vm66_vm0, %v3156_v15  ;;  %212 = vmatprep.subr.mxu0 %v53_v18  ;;  %v506_v23 = vpop.permute.xlu1 %505 }
  0x81   :  { %213 = vmatpush1.msra.mxu0 %v59_v21  ;;  %276 = vmatprep.mubr.f32.mxu0 %v3647_v4  ;;  %v515_v28 = vsel %vm513_vm2, %v504_v22, %v506_v23 }
  0x82   :  { %286 = vmatprep.subr.mxu0 %v3706_v0 }
  0x84   :  { %v502_v24 = vpop.permute.xlu0 %501  ;;  %3159 = vmatmul.mubr.msk.f32.vlgmr.msra.gmra.mrb[4].mxu0 %vm66_vm0, %v3156_v15  ;;  %v508_v25 = vpop.permute.xlu1 %507 }
  0x85   :  { %287 = vmatpush1.msra.mxu0 %v3711_v1  ;;  %350 = vmatprep.mubr.f32.mxu0 %v3647_v4  ;;  %v516_v30 = vsel %vm513_vm2, %v506_v23, %v508_v25  ;;  %v514_v32 = vsel %vm513_vm2, %v502_v24, %v504_v22  ;;  %v3183_v24 = vld [vmem:[%s4311_s1 + $0x38] sm:$0xff] }
  0x86   :  { %428 = vmatprep.subr.mxu0 %v3739_v6 }
  0x88   :  { %v510_v26 = vpop.permute.xlu0 %509  ;;  %v512_v27 = vpop.permute.xlu1 %511  ;;  %3160 = vmatmul.mubr.msk.f32.vlgmr.msra.gmra.mrb[0].mxu0 %vm66_vm0, %v3744_v7 }
  0x89   :  { %429 = vmatpush1.msra.mxu0 %v3734_v5  ;;  %v517_v29 = vsel %vm513_vm2, %v508_v25, %v510_v26  ;;  %492 = vmatprep.mubr.f32.mxu0 %v3647_v4  ;;  %v518_v35 = vsel %vm513_vm2, %v510_v26, %v512_v27 }
  0x8a   :  { %528 = vmatprep.subr.mxu0 %v515_v28  ;;  %599 = vmatprep.subr.mxu1 %v517_v29 }
  0x8b   :  { %600 = vmatpush1.msra.mxu1 %v516_v30 }
  0x8c   :  { %v752_v33 = vpop.permute.xlu0 %751  ;;  %v754_v34 = vpop.permute.xlu1 %753  ;;  %3162 = vmatmul.mubr.msk.f32.vlgmr.msra.gmra.mrb[4].mxu0 %vm66_vm0, %v3744_v7  ;;  %3165 = vmatmul.mubr.msk.f32.vlgmr.msra.gmra.mrb[0].mxu1 %vm66_vm0, %v3163_v31 }
  0x8d   :  { %529 = vmatpush1.msra.mxu0 %v514_v32  ;;  %592 = vmatprep.mubr.f32.mxu0 %v3647_v4  ;;  %v763_v38 = vsel %vm761_vm3, %v752_v33, %v754_v34 }
  0x8e   :  { %670 = vmatprep.subr.mxu0 %v512_v27  ;;  %911 = vmatprep.mubr.f32.mxu1 %v3647_v4 }
  0x90   :  { %v750_v36 = vpop.permute.xlu0 %749  ;;  %v756_v37 = vpop.permute.xlu1 %755  ;;  %3164 = vmatmul.mubr.msk.f32.vlgmr.msra.gmra.mrb[0].mxu0 %vm66_vm0, %v3163_v31 }
  0x91   :  { %671 = vmatpush1.msra.mxu0 %v518_v35  ;;  %734 = vmatprep.mubr.f32.mxu0 %v3647_v4  ;;  %v762_v39 = vsel %vm761_vm3, %v750_v36, %v752_v33  ;;  %v764_v44 = vsel %vm761_vm3, %v754_v34, %v756_v37  ;;  %v3187_v36 = vld [vmem:[%s4311_s1 + $0x40] sm:$0xff]  ;;  %s3658_s1 = smov 60  }
  0x92   :  { %776 = vmatprep.subr.mxu0 %v763_v38 }
  0x94   :  { %v758_v40 = vpop.permute.xlu0 %757  ;;  %v760_v41 = vpop.permute.xlu1 %759  ;;  %3166 = vmatmul.mubr.msk.f32.vlgmr.msra.gmra.mrb[4].mxu0 %vm66_vm0, %v3163_v31 }
  0x95   :  { %777 = vmatpush1.msra.mxu0 %v762_v39  ;;  %v765_v42 = vsel %vm761_vm3, %v756_v37, %v758_v40  ;;  %840 = vmatprep.mubr.f32.mxu0 %v3647_v4  ;;  %v766_v45 = vsel %vm761_vm3, %v758_v40, %v760_v41 }
  0x96   :  { %847 = vmatprep.subr.mxu1 %v765_v42  ;;  %918 = vmatprep.subr.mxu0 %v760_v41 }
  0x97   :  { %848 = vmatpush1.msra.mxu1 %v764_v44 }
  0x98   :  { %v1000_v46 = vpop.permute.xlu0 %999  ;;  %v1002_v47 = vpop.permute.xlu1 %1001  ;;  %3168 = vmatmul.mubr.msk.f32.vlgmr.msra.gmra.mrb[0].mxu0 %vm66_vm0, %v3167_v43  ;;  %3169 = vmatmul.mubr.msk.f32.vlgmr.msra.gmra.mrb[0].mxu1 %vm66_vm0, %v3167_v43 }
  0x99   :  { %919 = vmatpush1.msra.mxu0 %v766_v45  ;;  %v1011_v48 = vsel %vm1009_vm4, %v1000_v46, %v1002_v47  ;;  %982 = vmatprep.mubr.f32.mxu0 %v3647_v4 }
  0x9a   :  { %1024 = vmatprep.subr.mxu0 %v1011_v48  ;;  %1159 = vmatprep.mubr.f32.mxu1 %v3647_v4 }
  0x9c   :  { %v998_v49 = vpop.permute.xlu0 %997  ;;  %v1004_v50 = vpop.permute.xlu1 %1003  ;;  %3170 = vmatmul.mubr.msk.f32.vlgmr.msra.gmra.mrb[4].mxu0 %vm66_vm0, %v3167_v43 }
  0x9d   :  { %v1010_v51 = vsel %vm1009_vm4, %v998_v49, %v1000_v46  ;;  %1088 = vmatprep.mubr.f32.mxu0 %v3647_v4  ;;  %v1012_v57 = vsel %vm1009_vm4, %v1002_v47, %v1004_v50 }
  0x9e   :  { %1025 = vmatpush1.msra.mxu0 %v1010_v51 }
  0xa0   :  { %v1006_v53 = vpop.permute.xlu0 %1005  ;;  %v1008_v54 = vpop.permute.xlu1 %1007  ;;  %3172 = vmatmul.mubr.msk.f32.vlgmr.msra.gmra.mrb[0].mxu0 %vm66_vm0, %v3171_v52 }
  0xa1   :  { %v1014_v55 = vsel %vm1009_vm4, %v1006_v53, %v1008_v54  ;;  %1166 = vmatprep.subr.mxu0 %v1008_v54  ;;  %v1013_v56 = vsel %vm1009_vm4, %v1004_v50, %v1006_v53  ;;  %1230 = vmatprep.mubr.f32.mxu0 %v3647_v4 }
  0xa2   :  { %1095 = vmatprep.subr.mxu1 %v1013_v56  ;;  %1167 = vmatpush1.msra.mxu0 %v1014_v55 }
  0xa3   :  { %1096 = vmatpush1.msra.mxu1 %v1012_v57 }
  0xa4   :  { %v1248_v58 = vpop.permute.xlu0 %1247  ;;  %v1250_v59 = vpop.permute.xlu1 %1249  ;;  %3174 = vmatmul.mubr.msk.f32.vlgmr.msra.gmra.mrb[4].mxu0 %vm66_vm0, %v3171_v52  ;;  %3173 = vmatmul.mubr.msk.f32.vlgmr.msra.gmra.mrb[0].mxu1 %vm66_vm0, %v3171_v52 }
  0xa5   :  { %v1259_v60 = vsel %vm1257_vm5, %v1248_v58, %v1250_v59  ;;  %1336 = vmatprep.mubr.f32.mxu0 %v3647_v4  ;;  %1407 = vmatprep.mubr.f32.mxu1 %v3647_v4 }
  0xa6   :  { %1272 = vmatprep.subr.mxu0 %v1259_v60 }
  0xa8   :  { %v1246_v61 = vpop.permute.xlu0 %1245  ;;  %v1252_v62 = vpop.permute.xlu1 %1251 }
  0xa9   :  { %v1258_v0 = vsel %vm1257_vm5, %v1246_v61, %v1248_v58  ;;  %v1260_v6 = vsel %vm1257_vm5, %v1250_v59, %v1252_v62 }
  0xaa   :  { %1273 = vmatpush1.msra.mxu0 %v1258_v0 }
  0xab   :  { %3176 = vmatmul.mubr.msk.f32.vlgmr.msra.gmra.mrb[0].mxu0 %vm66_vm0, %v3175_v63 }
  0xac   :  { %v1254_v1 = vpop.permute.xlu0 %1253  ;;  %v1256_v2 = vpop.permute.xlu1 %1255  ;;  %1478 = vmatprep.mubr.f32.mxu0 %v3647_v4 }
  0xad   :  { %v1262_v3 = vsel %vm1257_vm5, %v1254_v1, %v1256_v2  ;;  %1414 = vmatprep.subr.mxu0 %v1256_v2  ;;  %v1261_v5 = vsel %vm1257_vm5, %v1252_v62, %v1254_v1  ;;  %v2323_v2 = vlaneseq }
  0xae   :  { %1343 = vmatprep.subr.mxu1 %v1261_v5  ;;  %1415 = vmatpush1.msra.mxu0 %v1262_v3 }
  0xaf   :  { %1344 = vmatpush1.msra.mxu1 %v1260_v6  ;;  %3178 = vmatmul.mubr.msk.f32.vlgmr.msra.gmra.mrb[4].mxu0 %vm66_vm0, %v3175_v63  ;;  %v2366_v3 = vand.u32 127, %v2323_v2 }
  0xb0   :  { %v1496_v7 = vpop.permute.xlu0 %1495  ;;  %v1498_v8 = vpop.permute.xlu1 %1497  ;;  %1584 = vmatprep.mubr.f32.mxu0 %v3647_v4  ;;  %3177 = vmatmul.mubr.msk.f32.vlgmr.msra.gmra.mrb[0].mxu1 %vm66_vm0, %v3175_v63 }
  0xb1   :  { %v1507_v9 = vsel %vm1505_vm6, %v1496_v7, %v1498_v8  ;;  %1655 = vmatprep.mubr.f32.mxu1 %v3647_v4  ;;  %v2367_v6 = vshra.s32 %v2366_v3, 3 }
  0xb2   :  { %1520 = vmatprep.subr.mxu0 %v1507_v9 }
  0xb3   :  { %v2368_v9 = vmul.u32 2, %v2367_v6 }
  0xb4   :  { %v1494_v10 = vpop.permute.xlu0 %1493  ;;  %v1500_v11 = vpop.permute.xlu1 %1499 }
  0xb5   :  { %v1506_v13 = vsel %vm1505_vm6, %v1494_v10, %v1496_v7  ;;  %v1508_v18 = vsel %vm1505_vm6, %v1498_v8, %v1500_v11  ;;  %v2371_v7 = vand.u32 7, %v2366_v3  ;;  %v3952_v8 = vshrl.u32 %v2323_v2, 7 }
  0xb6   :  { %1521 = vmatpush1.msra.mxu0 %v1506_v13 }
  0xb7   :  { %3180 = vmatmul.mubr.msk.f32.vlgmr.msra.gmra.mrb[0].mxu0 %vm66_vm0, %v3179_v12  ;;  %v2372_v10 = vmul.u32 2, %v2371_v7  ;;  %v2340_v13 = vadd.s32 128, %v3952_v8  ;;  %v2339_v2 = vadd.s32 120, %v3952_v8 }
  0xb8   :  { %v1502_v14 = vpop.permute.xlu0 %1501  ;;  %v1504_v15 = vpop.permute.xlu1 %1503  ;;  %1726 = vmatprep.mubr.f32.mxu0 %v3647_v4 }
  0xb9   :  { %v1510_v16 = vsel %vm1505_vm6, %v1502_v14, %v1504_v15  ;;  %1662 = vmatprep.subr.mxu0 %v1504_v15  ;;  %v1509_v17 = vsel %vm1505_vm6, %v1500_v11, %v1502_v14  ;;  %v2369_v11 = vadd.s32 1, %v2368_v9  ;;  %v2341_v14 = vadd.s32 136, %v3952_v8 }
  0xba   :  { %1591 = vmatprep.subr.mxu1 %v1509_v17  ;;  %1663 = vmatpush1.msra.mxu0 %v1510_v16  ;;  %v2325_v16 = vadd.s32 8, %v3952_v8  ;;  %v2342_v17 = vadd.s32 144, %v3952_v8 }
  0xbb   :  { %1592 = vmatpush1.msra.mxu1 %v1508_v18  ;;  %3182 = vmatmul.mubr.msk.f32.vlgmr.msra.gmra.mrb[4].mxu0 %vm66_vm0, %v3179_v12  ;;  %v2370_v15 = vmul.u32 18, %v2369_v11  ;;  %v2343_v18 = vadd.s32 152, %v3952_v8 }
  0xbc   :  { %v1744_v19 = vpop.permute.xlu0 %1743  ;;  %v1746_v20 = vpop.permute.xlu1 %1745  ;;  %3181 = vmatmul.mubr.msk.f32.vlgmr.msra.gmra.mrb[0].mxu1 %vm66_vm0, %v3179_v12  ;;  %1832 = vmatprep.mubr.f32.mxu0 %v3647_v4  ;;  %v2373_v12 = vadd.s32 1, %v2372_v10 }
  0xbd   :  { %v1755_v21 = vsel %vm1753_vm7, %v1744_v19, %v1746_v20  ;;  %1903 = vmatprep.mubr.f32.mxu1 %v3647_v4 }
  0xbe   :  { %1768 = vmatprep.subr.mxu0 %v1755_v21  ;;  %v3961_v21 = vadd.s32 %v2373_v12, %v2370_v15 }
  0xc0   :  { %v1742_v22 = vpop.permute.xlu0 %1741  ;;  %v1748_v23 = vpop.permute.xlu1 %1747  ;;  %vm2391_vm9 = vcmp.eq.s32.totalorder %v2340_v13, %v3961_v21  ;;  %vm2392_vm10 = vcmp.eq.s32.totalorder %v2341_v14, %v3961_v21  ;;  %vm2375_vm11 = vcmp.eq.s32.totalorder %v3952_v8, %v3961_v21  ;;  %vm2376_vm12 = vcmp.eq.s32.totalorder %v2325_v16, %v3961_v21 }
  0xc1   :  { %v1754_v25 = vsel %vm1753_vm7, %v1742_v22, %v1744_v19  ;;  %v1756_v30 = vsel %vm1753_vm7, %v1746_v20, %v1748_v23  ;;  %v2326_v19 = vadd.s32 16, %v3952_v8  ;;  %v2327_v20 = vadd.s32 24, %v3952_v8  ;;  %vm3972_vm13 = vmpackc.low %vm2392_vm10, %vm2391_vm9 }
  0xc2   :  { %1769 = vmatpush1.msra.mxu0 %v1754_v25  ;;  %v2344_v22 = vadd.s32 160, %v3952_v8  ;;  %v2329_v25 = vadd.s32 40, %v3952_v8  ;;  %vm2393_vm14 = vcmp.eq.s32.totalorder %v2342_v17, %v3961_v21  ;;  %vm2394_vm15 = vcmp.eq.s32.totalorder %v2343_v18, %v3961_v21  ;;  %vm3983_vm4 = vmpackc.low %vm2376_vm12, %vm2375_vm11 }
  0xc3   :  { %3184 = vmatmul.mubr.msk.f32.vlgmr.msra.gmra.mrb[0].mxu0 %vm66_vm0, %v3183_v24  ;;  %vm2378_vm2 = vcmp.eq.s32.totalorder %v2327_v20, %v3961_v21  ;;  %v3657_v13 = vmov 0.0|0.0  }
  0xc4   :  { %v1750_v26 = vpop.permute.xlu0 %1749  ;;  %v1752_v27 = vpop.permute.xlu1 %1751  ;;  %1974 = vmatprep.mubr.f32.mxu0 %v3647_v4  ;;  %vm2395_vm5 = vcmp.eq.s32.totalorder %v2344_v22, %v3961_v21  ;;  %vm2380_vm11 = vcmp.eq.s32.totalorder %v2329_v25, %v3961_v21 }
  0xc5   :  { %v1758_v28 = vsel %vm1753_vm7, %v1750_v26, %v1752_v27  ;;  %1910 = vmatprep.subr.mxu0 %v1752_v27  ;;  %v1757_v29 = vsel %vm1753_vm7, %v1748_v23, %v1750_v26  ;;  %v2345_v23 = vadd.s32 168, %v3952_v8  ;;  %v3656_v27 = vmov 1.0|1.0   ;;  %vm3434_vm7 = vmpackc.low %vm2394_vm15, %vm2393_vm14 }
  0xc6   :  { %1839 = vmatprep.subr.mxu1 %v1757_v29  ;;  %1911 = vmatpush1.msra.mxu0 %v1758_v28  ;;  %v2346_v29 = vadd.s32 176, %v3952_v8 }
  0xc7   :  { %1840 = vmatpush1.msra.mxu1 %v1756_v30  ;;  %3186 = vmatmul.mubr.msk.f32.vlgmr.msra.gmra.mrb[4].mxu0 %vm66_vm0, %v3183_v24  ;;  %vm2396_vm6 = vcmp.eq.s32.totalorder %v2345_v23, %v3961_v21  ;;  %v2347_v30 = vadd.s32 184, %v3952_v8 }
  0xc8   :  { %v1992_v31 = vpop.permute.xlu0 %1991  ;;  %v1994_v32 = vpop.permute.xlu1 %1993  ;;  %3185 = vmatmul.mubr.msk.f32.vlgmr.msra.gmra.mrb[0].mxu1 %vm66_vm0, %v3183_v24  ;;  %2080 = vmatprep.mubr.f32.mxu0 %v3647_v4  ;;  %v2328_v24 = vadd.s32 32, %v3952_v8  ;;  %vm3999_vm9 = vmpackc.low %vm2396_vm6, %vm2395_vm5  ;;  %vm2397_vm12 = vcmp.eq.s32.totalorder %v2346_v29, %v3961_v21  ;;  %v2358_v29 = vadd.s32 272, %v3952_v8 }
  0xc9   :  { %v2003_v33 = vsel %vm2001_vm8, %v1992_v31, %v1994_v32  ;;  %2151 = vmatprep.mubr.f32.mxu1 %v3647_v4  ;;  %vm2398_vm14 = vcmp.eq.s32.totalorder %v2347_v30, %v3961_v21  ;;  %v2359_v30 = vadd.s32 280, %v3952_v8 }
  0xca   :  { %2016 = vmatprep.subr.mxu0 %v2003_v33  ;;  %vm2379_vm10 = vcmp.eq.s32.totalorder %v2328_v24, %v3961_v21  ;;  %v2330_v33 = vadd.s32 48, %v3952_v8  ;;  %vm4028_vm15 = vmpackc.low %vm2398_vm14, %vm2397_vm12 }
  0xcc   :  { %v1990_v34 = vpop.permute.xlu0 %1989  ;;  %v1996_v35 = vpop.permute.xlu1 %1995 }
  0xcd   :  { %v2002_v37 = vsel %vm2001_vm8, %v1990_v34, %v1992_v31  ;;  %v2004_v42 = vsel %vm2001_vm8, %v1994_v32, %v1996_v35  ;;  %v2331_v34 = vadd.s32 56, %v3952_v8 }
  0xce   :  { %2017 = vmatpush1.msra.mxu0 %v2002_v37  ;;  %v2360_v37 = vadd.s32 288, %v3952_v8 }
  0xcf   :  { %3188 = vmatmul.mubr.msk.f32.vlgmr.msra.gmra.mrb[0].mxu0 %vm66_vm0, %v3187_v36 }
  0xd0   :  { %v1998_v38 = vpop.permute.xlu0 %1997  ;;  %v2000_v39 = vpop.permute.xlu1 %1999  ;;  %2222 = vmatprep.mubr.f32.mxu0 %v3647_v4 }
  0xd1   :  { %v2006_v40 = vsel %vm2001_vm8, %v1998_v38, %v2000_v39  ;;  %2158 = vmatprep.subr.mxu0 %v2000_v39  ;;  %v2005_v41 = vsel %vm2001_vm8, %v1996_v35, %v1998_v38  ;;  %v2348_v35 = vadd.s32 192, %v3952_v8  ;;  %v2332_v39 = vadd.s32 64, %v3952_v8 }
  0xd2   :  { %2087 = vmatprep.subr.mxu1 %v2005_v41  ;;  %2159 = vmatpush1.msra.mxu0 %v2006_v40  ;;  %v2333_v40 = vadd.s32 72, %v3952_v8  ;;  %v2350_v41 = vadd.s32 208, %v3952_v8  ;;  %v2361_v38 = vadd.s32 296, %v3952_v8 }
  0xd3   :  { %2088 = vmatpush1.msra.mxu1 %v2004_v42  ;;  %3190 = vmatmul.mubr.msk.f32.vlgmr.msra.gmra.mrb[4].mxu0 %vm66_vm0, %v3187_v36  ;;  %v2351_v42 = vadd.s32 216, %v3952_v8 }
  0xd4   :  { %3189 = vmatmul.mubr.msk.f32.vlgmr.msra.gmra.mrb[0].mxu1 %vm66_vm0, %v3187_v36  ;;  %vm2377_vm0 = vcmp.eq.s32.totalorder %v2326_v19, %v3961_v21  ;;  %3431 = vmatprep.subr.msk.bf16.mxu1 %vm3972_vm13, %v3656_v27  ;;  %v2349_v36 = vadd.s32 200, %v3952_v8 }
  0xd5   :  { %3433 = vmatpush3.bf16.msk.msra.mxu1 %vm3983_vm4, %v3656_v27  ;;  %vm3995_vm8 = vmpackc.low %vm2378_vm2, %vm2377_vm0  ;;  %3475 = vmatprep.subr.msk.bf16.mxu0 %vm3972_vm13, %v3656_v27  ;;  %vm2381_vm0 = vcmp.eq.s32.totalorder %v2330_v33, %v3961_v21  ;;  %vm2382_vm2 = vcmp.eq.s32.totalorder %v2331_v34, %v3961_v21  ;;  %vm2402_vm12 = vcmp.eq.s32.totalorder %v2351_v42, %v3961_v21 }
  0xd6   :  { %3435 = vmatprep.subr.msk.bf16.mxu1 %vm3434_vm7, %v3656_v27  ;;  %3477 = vmatpush3.bf16.msk.msra.mxu0 %vm3983_vm4, %v3656_v27  ;;  %vm4024_vm13 = vmpackc.low %vm2380_vm11, %vm2379_vm10  ;;  %vm2399_vm4 = vcmp.eq.s32.totalorder %v2348_v35, %v3961_v21  ;;  %vm2400_vm5 = vcmp.eq.s32.totalorder %v2349_v36, %v3961_v21  ;;  %vm2383_vm10 = vcmp.eq.s32.totalorder %v2332_v39, %v3961_v21 }
  0xd7   :  { %3479 = vmatprep.subr.msk.bf16.mxu0 %vm3434_vm7, %v3656_v27  ;;  %vm3444_vm6 = vmpackc.low %vm2382_vm2, %vm2381_vm0  ;;  %vm2384_vm11 = vcmp.eq.s32.totalorder %v2333_v40, %v3961_v21  ;;  %v2362_v40 = vadd.s32 304, %v3952_v8 }
  0xd8   :  { %vm3446_vm7 = vmpackc.low %vm2400_vm5, %vm2399_vm4 }
  0xd9   :  { %3437 = vmatpush3.bf16.msk.msra.mxu1 %vm3995_vm8, %v3656_v27 }
  0xda   :  { %3439 = vmatprep.subr.msk.bf16.mxu1 %vm3999_vm9, %v3656_v27  ;;  %3481 = vmatpush3.bf16.msk.msra.mxu0 %vm3995_vm8, %v3656_v27  ;;  %vm3448_vm8 = vmpackc.low %vm2384_vm11, %vm2383_vm10 }
  0xdb   :  { %3483 = vmatprep.subr.msk.bf16.mxu0 %vm3999_vm9, %v3656_v27  ;;  %vm2401_vm9 = vcmp.eq.s32.totalorder %v2350_v41, %v3961_v21  ;;  %v2363_v41 = vadd.s32 312, %v3952_v8 }
  0xdc   :  { %vm3450_vm14 = vmpackc.low %vm2402_vm12, %vm2401_vm9 }
  0xdd   :  { %3441 = vmatpush3.bf16.msk.msra.mxu1 %vm4024_vm13, %v3656_v27 }
  0xde   :  { %3443 = vmatprep.subr.msk.bf16.mxu1 %vm4028_vm15, %v3656_v27  ;;  %3485 = vmatpush3.bf16.msk.msra.mxu0 %vm4024_vm13, %v3656_v27 }
  0xdf   :  { %3487 = vmatprep.subr.msk.bf16.mxu0 %vm4028_vm15, %v3656_v27 }
  0xe1   :  { %v2239_v46 = vpop.permute.xlu0 %2238  ;;  %3445 = vmatpush3.bf16.msk.msra.mxu1 %vm3444_vm6, %v3656_v27 }
  0xe2   :  { %3447 = vmatprep.subr.msk.bf16.mxu1 %vm3446_vm7, %v3656_v27  ;;  %3489 = vmatpush3.bf16.msk.msra.mxu0 %vm3444_vm6, %v3656_v27 }
  0xe3   :  { %3491 = vmatprep.subr.msk.bf16.mxu0 %vm3446_vm7, %v3656_v27 }
  0xe5   :  { %3449 = vmatpush3.bf16.msk.msra.mxu1 %vm3448_vm8, %v3656_v27 }
  0xe6   :  { %3493 = vmatpush3.bf16.msk.msra.mxu0 %vm3448_vm8, %v3656_v27  ;;  %3451 = vmatprep.subr.msk.bf16.mxu1 %vm3450_vm14, %v3656_v27 }
  0xe7   :  { %3495 = vmatprep.subr.msk.bf16.mxu0 %vm3450_vm14, %v3656_v27  ;;  %vm2390_vm14 = vcmp.eq.s32.totalorder %v2339_v2, %v3961_v21 }
 0x153   :  { %v207_v43 = vpop.f32.mrb[2].mxu0 }
 0x154   :  { %v209_v44 = vpop.f32.mrb[3].mxu0 }
 0x1a2   :  { %v2082_v45 = vpop.f32.mrb[0].mxu0 }
 0x1a3   :  { %v2084_v47 = vpop.f32.mrb[1].mxu0  ;;  %v3917_v48 = vadd.f32 %v2239_v46, %v2082_v45 }
 0x1a4   :  { %v3919_v49 = vadd.f32 %v2239_v46, %v2084_v47  ;;  %v2353_v47 = vadd.s32 232, %v3952_v8 }
 0x1a5   :  { %v2247_v57 = vmax.f32 %v3917_v48, 0.0  ;;  %v2357_v48 = vadd.s32 264, %v3952_v8 }
 0x1a6   :  { %v2224_v50 = vpop.f32.mrb[4].mxu0  ;;  %v2248_v58 = vmax.f32 %v3919_v49, 0.0  ;;  %vm2404_vm4 = vcmp.eq.s32.totalorder %v2353_v47, %v3961_v21 }
 0x1a7   :  { %v2153_v51 = vpop.f32.mrb[0].mxu1  ;;  %v2226_v52 = vpop.f32.mrb[5].mxu0  ;;  %v3931_v61 = vadd.f32 %v2239_v46, %v2224_v50  ;;  %v2336_v50 = vadd.s32 96, %v3952_v8 }
 0x1a8   :  { %v3538_v53 = vadd.f32 %v2153_v51, %v207_v43  ;;  %v3921_v54 = vadd.f32 %v2239_v46, %v2226_v52  ;;  %v2155_v55 = vpop.f32.mrb[1].mxu1  ;;  %v3606_v63 = vpack.i.bf16 %v2247_v57, %v2248_v58  ;;  %v2334_v43 = vadd.s32 80, %v3952_v8 }
 0x1a9   :  { %v3539_v56 = vadd.f32 %v2155_v55, %v209_v44  ;;  %v2251_v0 = vmax.f32 %v3931_v61, 0.0  ;;  %v2335_v44 = vadd.s32 88, %v3952_v8  ;;  %v2337_v51 = vadd.s32 104, %v3952_v8 }
 0x1aa   :  { %v2252_v59 = vmax.f32 %v3921_v54, 0.0  ;;  %v3943_v1 = vadd.f32 %v3538_v53, %v2239_v46  ;;  %vm2385_vm13 = vcmp.eq.s32.totalorder %v2334_v43, %v3961_v21  ;;  %vm2387_vm6 = vcmp.eq.s32.totalorder %v2336_v50, %v3961_v21 }
 0x1ab   :  { %v3926_v60 = vadd.f32 %v3539_v56, %v2239_v46  ;;  %vm2386_vm15 = vcmp.eq.s32.totalorder %v2335_v44, %v3961_v21  ;;  %v2352_v46 = vadd.s32 224, %v3952_v8  ;;  %vm2388_vm7 = vcmp.eq.s32.totalorder %v2337_v51, %v3961_v21 }
 0x1ac   :  { %2269 = vrot.lane.b32.xlu0 %v2252_v59, %s3646_s28  ;;  %v2249_v5 = vmax.f32 %v3943_v1, 0.0  ;;  %vm3452_vm0 = vmpackc.low %vm2386_vm15, %vm2385_vm13  ;;  %v2354_v53 = vadd.s32 240, %v3952_v8  ;;  %v2355_v55 = vadd.s32 248, %v3952_v8  ;;  %vm2408_vm15 = vcmp.eq.s32.totalorder %v2357_v48, %v3961_v21  ;;  %v2871_v48 = vld [vmem:[%s4313_s3 + $0x30] sm:$0xff] }
 0x1ad   :  { %v2250_v62 = vmax.f32 %v3926_v60, 0.0  ;;  %3453 = vmatpush3.bf16.msk.msra.mxu1 %vm3452_vm0, %v3656_v27  ;;  %3497 = vmatpush3.bf16.msk.msra.mxu0 %vm3452_vm0, %v3656_v27  ;;  %vm2403_vm2 = vcmp.eq.s32.totalorder %v2352_v46, %v3961_v21  ;;  %vm3456_vm10 = vmpackc.low %vm2388_vm7, %vm2387_vm6  ;;  %vm2411_vm6 = vcmp.eq.s32.totalorder %v2360_v37, %v3961_v21  ;;  %vm2412_vm7 = vcmp.eq.s32.totalorder %v2361_v38, %v3961_v21  ;;  %v2875_v37 = vld [vmem:[%s4313_s3 + $0x50] sm:$0xff] }
 0x1ae   :  { %vm3454_vm5 = vmpackc.low %vm2404_vm4, %vm2403_vm2  ;;  %vm2405_vm11 = vcmp.eq.s32.totalorder %v2354_v53, %v3961_v21  ;;  %vm2406_vm8 = vcmp.eq.s32.totalorder %v2355_v55, %v3961_v21  ;;  %vm2409_vm2 = vcmp.eq.s32.totalorder %v2358_v29, %v3961_v21  ;;  %vm2410_vm4 = vcmp.eq.s32.totalorder %v2359_v30, %v3961_v21  ;;  %v2878_v29 = vld [vmem:[%s4313_s3 + $0x68] sm:$0xff]  ;;  %v2873_v30 = vld [vmem:[%s4313_s3 + $0x40] sm:$0xff] }
 0x1af   :  { %2265 = vrot.lane.b32.xlu1 %v2250_v62, %s3646_s28  ;;  %3455 = vmatprep.subr.msk.bf16.mxu1 %vm3454_vm5, %v3656_v27  ;;  %vm3458_vm9 = vmpackc.low %vm2406_vm8, %vm2405_vm11  ;;  %vm2413_vm11 = vcmp.eq.s32.totalorder %v2362_v40, %v3961_v21  ;;  %vm2414_vm8 = vcmp.eq.s32.totalorder %v2363_v41, %v3961_v21  ;;  %v2364_v43 = vadd.s32 320, %v3952_v8  ;;  %v2879_v38 = vld [vmem:[%s4313_s3 + $0x70] sm:$0xff] }
 0x1b0   :  { %3607 = vrot.lane.b32.xlu0 %v3606_v63, %s3646_s28  ;;  %3499 = vmatprep.subr.msk.bf16.mxu0 %vm3454_vm5, %v3656_v27  ;;  %v2338_v63 = vadd.s32 112, %v3952_v8  ;;  %vm4148_vm5 = vmpackc.low %vm2410_vm4, %vm2409_vm2  ;;  %vm3060_vm2 = vcmask 261120  }
 0x1b1   :  { %3457 = vmatpush3.bf16.msk.msra.mxu1 %vm3456_vm10, %v3656_v27  ;;  %3501 = vmatpush3.bf16.msk.msra.mxu0 %vm3456_vm10, %v3656_v27  ;;  %vm4160_vm10 = vmpackc.low %vm2412_vm7, %vm2411_vm6 }
 0x1b2   :  { %vm2389_vm12 = vcmp.eq.s32.totalorder %v2338_v63, %v3961_v21  ;;  %3459 = vmatprep.subr.msk.bf16.mxu1 %vm3458_vm9, %v3656_v27  ;;  %3503 = vmatprep.subr.msk.bf16.mxu0 %vm3458_vm9, %v3656_v27  ;;  %vm4171_vm9 = vmpackc.low %vm2414_vm8, %vm2413_vm11 }
 0x1b3   :  { %2267 = vrot.lane.b32.xlu1 %v2251_v0, %s3646_s28  ;;  %vm3460_vm13 = vmpackc.low %vm2390_vm14, %vm2389_vm12  ;;  %vm2415_vm12 = vcmp.eq.s32.totalorder %v2364_v43, %v3961_v21  ;;  %vm2461_vm14 = vcmask 1043456  }
 0x1b4   :  { %vm3536_vm4 = vmpackc.low %vm3060_vm2, %vm3060_vm2 }
 0x1b5   :  { %3461 = vmatpush3.bf16.msk.msra.mxu1 %vm3460_vm13, %v3656_v27  ;;  %3505 = vmatpush3.bf16.msk.msra.mxu0 %vm3460_vm13, %v3656_v27  ;;  %vm2457_vm13 = vcmask 556032  }
 0x1b6   :  { %3462 = vmatprep.subr.bf16.mxu1 %v3657_v13 }
 0x1b7   :  { %2263 = vrot.lane.b32.xlu1 %v2249_v5, %s3646_s28  ;;  %s3661_s28 = smov 64  }
 0x21e   :  { %v2270_v45 = vpop.permute.xlu0 %2269 }
 0x21f   :  { %v2287_v61 = vmax.f32 %v2252_v59, %v2270_v45 }
 0x221   :  { %v2266_v52 = vpop.permute.xlu1 %2265 }
 0x222   :  { %v3608_v56 = vpop.permute.xlu0 %3607 }
 0x223   :  { %v3610_v6 = vunpack.i.h.bf16 %v3608_v56  ;;  %v3609_v7 = vunpack.i.l.bf16 %v3608_v56 }
 0x225   :  { %v2268_v3 = vpop.permute.xlu1 %2267  ;;  %v2271_v15 = vsel %vm54_vm1, %v3610_v6, %v3609_v7 }
 0x226   :  { %v2274_v9 = vsel %vm54_vm1, %v2266_v52, %v2268_v3  ;;  %v2275_v10 = vsel %vm54_vm1, %v2268_v3, %v2270_v45  ;;  %v2282_v17 = vmax.f32 %v2247_v57, %v2271_v15  ;;  %v2456_v45 = vsel %vm2415_vm12, 1.0, %v3647_v4 }
 0x227   :  { %v2285_v11 = vmax.f32 %v2250_v62, %v2274_v9  ;;  %v2286_v12 = vmax.f32 %v2251_v0, %v2275_v10 }
 0x229   :  { %2300 = vrot.lane.b32.xlu1 %v2285_v11, %s3649_s0  ;;  %v2264_v14 = vpop.permute.xlu1 %2263  ;;  %2302 = vrot.lane.b32.xlu0 %v2286_v12, %s3649_s0 }
 0x22a   :  { %v2272_v60 = vsel %vm54_vm1, %v3609_v7, %v2264_v14  ;;  %v2273_v62 = vsel %vm54_vm1, %v2264_v14, %v2266_v52 }
 0x22b   :  { %v2283_v0 = vmax.f32 %v2248_v58, %v2272_v60  ;;  %v2284_v16 = vmax.f32 %v2249_v5, %v2273_v62  ;;  %v2356_v5 = vadd.s32 256, %v3952_v8 }
 0x22d   :  { %2304 = vrot.lane.b32.xlu1 %v2287_v61, %s3649_s0  ;;  %2298 = vrot.lane.b32.xlu0 %v2284_v16, %s3649_s0  ;;  %v3611_v18 = vpack.i.bf16 %v2282_v17, %v2283_v0  ;;  %vm2407_vm1 = vcmp.eq.s32.totalorder %v2356_v5, %v3961_v21 }
 0x22e   :  { %vm4134_vm0 = vmpackc.low %vm2408_vm15, %vm2407_vm1  ;;  %vm2667_vm1 = vcmask 490496   ;;  %vm2605_vm15 = vcmask 516096  }
 0x231   :  { %3612 = vrot.lane.b32.xlu1 %v3611_v18, %s3649_s0  ;;  %v2870_v18 = vld [vmem:[%s4313_s3 + $0x28] sm:$0xff] }
 0x29b   :  { %v2301_v19 = vpop.permute.xlu1 %2300  ;;  %v2303_v20 = vpop.permute.xlu0 %2302 }
 0x29c   :  { %v2309_v54 = vsel %vm761_vm3, %v2301_v19, %v2303_v20 }
 0x29d   :  { %v2320_v22 = vmax.f32 %v2285_v11, %v2309_v54  ;;  %v2869_v54 = vld [vmem:[%s4313_s3 + $0x20] sm:$0xff] }
 0x29f   :  { %v2305_v59 = vpop.permute.xlu1 %2304  ;;  %v2299_v49 = vpop.permute.xlu0 %2298 }
 0x2a0   :  { %v2310_v58 = vsel %vm761_vm3, %v2303_v20, %v2305_v59  ;;  %v2308_v1 = vsel %vm761_vm3, %v2299_v49, %v2301_v19  ;;  %v2322_v33 = vmax.f32 %v2287_v61, %v2305_v59  ;;  %v2865_v20 = vld [vmem:[%s4313_s3] sm:$0xff] }
 0x2a1   :  { %v2321_v23 = vmax.f32 %v2286_v12, %v2310_v58  ;;  %v2319_v24 = vmax.f32 %v2284_v16, %v2308_v1  ;;  %v2868_v58 = vld [vmem:[%s4313_s3 + $0x18] sm:$0xff] }
 0x2a2   :  { %v2872_v1 = vld [vmem:[%s4313_s3 + $0x38] sm:$0xff] }
 0x2a3   :  { %2663 = vrot.lane.b32.xlu1 %v2321_v23, %s3658_s1  ;;  %v3613_v57 = vpop.permute.xlu1 %3612  ;;  %v3616_v25 = vpack.i.bf16 %v2319_v24, %v2320_v22  ;;  %v3526_v23 = vpack.c.bf16 %v2872_v1, %v2868_v58 }
 0x2a4   :  { %v3615_v26 = vunpack.i.h.bf16 %v3613_v57  ;;  %v3614_v28 = vunpack.i.l.bf16 %v3613_v57 }
 0x2a5   :  { %3617 = vrot.lane.b32.xlu0 %v3616_v25, %s3658_s1  ;;  %3527 = vmatprep.subr.bf16.mxu0 %v3526_v23 }
 0x2a6   :  { %v2306_v31 = vsel %vm761_vm3, %v3615_v26, %v3614_v28  ;;  %v2307_v32 = vsel %vm761_vm3, %v3614_v28, %v2299_v49  ;;  %vm3659_vm3 = vmmov 0   ;;  %v3520_v49 = vpack.c.bf16 %v2869_v54, %v2865_v20  ;;  %v2874_v28 = vld [vmem:[%s4313_s3 + $0x48] sm:$0xff] }
 0x2a7   :  { %v2317_v34 = vmax.f32 %v2282_v17, %v2306_v31  ;;  %v2318_v35 = vmax.f32 %v2283_v0, %v2307_v32  ;;  %v2866_v17 = vld [vmem:[%s4313_s3 + $0x8] sm:$0xff]  ;;  %v3522_v32 = vpack.c.bf16 %v2878_v29, %v2874_v28 }
 0x2a8   :  { %v3518_v19 = vpack.c.bf16 %v2870_v18, %v2866_v17  ;;  %v3284_v17 = vld [vmem:[%s4316_s6] ss:$0 sm:$0xff] }
 0x2a9   :  { %2665 = vrot.lane.b32.xlu0 %v2322_v33, %s3658_s1  ;;  %2529 = vmatprep.mubr.f32.mxu1 %v2318_v35  ;;  %v2877_v33 = vld [vmem:[%s4313_s3 + $0x60] sm:$0xff]  ;;  %v2880_v35 = vld [vmem:[%s4313_s3 + $0x78] sm:$0xff] }
 0x2aa   :  { %2530 = vmatmul.mubr.f32.vlgmr.msra.gmra.mrb[2].mxu1 %v2317_v34  ;;  %v2876_v34 = vld [vmem:[%s4313_s3 + $0x58] sm:$0xff]  ;;  %v3524_v41 = vpack.c.bf16 %v2877_v33, %v2873_v30 }
 0x2ab   :  { %3464 = vmatpush3.bf16.msk.msra.mxu1 %vm4134_vm0, %v3656_v27  ;;  %3399 = vmatprep.mubr.msk.f32.mxu1 %vm3659_vm3, %v3647_v4  ;;  %v3530_v36 = vpack.c.bf16 %v2880_v35, %v2876_v34 }
 0x2ac   :  { %3465 = vmatprep.subr.bf16.mxu1 %v3657_v13 }
 0x2af   :  { %3467 = vmatpush3.bf16.msk.msra.mxu1 %vm4148_vm5, %v3656_v27 }
 0x2b0   :  { %3468 = vmatprep.subr.bf16.mxu1 %v3657_v13 }
 0x2b3   :  { %3470 = vmatpush3.bf16.msk.msra.mxu1 %vm4160_vm10, %v3656_v27 }
 0x2b4   :  { %3471 = vmatprep.subr.bf16.mxu1 %v3657_v13 }
 0x2b7   :  { %3473 = vmatpush3.bf16.msk.msra.mxu1 %vm4171_vm9, %v3656_v27 }
 0x2b8   :  { %3397 = vmatprep.subr.mxu1 %v3647_v4 }
 0x2bb   :  { %3398 = vmatpush3.msk.msra.mxu1 %vm2461_vm14, %v2456_v45 }
 0x2bc   :  { %3400 = vmatmul.mubr.msk.f32.vlgmr.msra.gmra.mrb[4].mxu1 %vm2457_vm13, %v2319_v24  ;;  %3506 = vmatprep.subr.bf16.mxu1 %v3657_v13  ;;  %v2867_v24 = vld [vmem:[%s4313_s3 + $0x10] sm:$0xff] }
 0x2bd   :  { %3508 = vmatpush3.bf16.msk.msra.mxu1 %vm4134_vm0, %v3656_v27  ;;  %3420 = vmatprep.mubr.msk.f32.mxu1 %vm3659_vm3, %v3647_v4  ;;  %v3528_v26 = vpack.c.bf16 %v2871_v48, %v2867_v24  ;;  %vm2620_vm0 = vcmask 1040896  }
 0x2be   :  { %3509 = vmatprep.subr.bf16.mxu1 %v3657_v13 }
 0x2c1   :  { %3511 = vmatpush3.bf16.msk.msra.mxu1 %vm4148_vm5, %v3656_v27 }
 0x2c2   :  { %3512 = vmatprep.subr.bf16.mxu1 %v3657_v13 }
 0x2c5   :  { %3514 = vmatpush3.bf16.msk.msra.mxu1 %vm4160_vm10, %v3656_v27 }
 0x2c6   :  { %3515 = vmatprep.subr.bf16.mxu1 %v3657_v13 }
 0x2c9   :  { %3517 = vmatpush3.bf16.msk.msra.mxu1 %vm4171_vm9, %v3656_v27  ;;  %v3660_v27 = vmov 1983009808  }
 0x2ca   :  { %3418 = vmatprep.subr.mxu1 %v3647_v4  ;;  %v2609_v3 = vunpack.c.l.s4 %v3660_v27 }
 0x2cc   :  { %v2610_v6 = vunpack.c.0.s8 %v2609_v3 }
 0x2cd   :  { %3419 = vmatpush3.msk.msra.mxu1 %vm2461_vm14, %v2456_v45  ;;  %v3532_v45 = vpack.c.bf16 %v2879_v38, %v2875_v37 }
 0x2ce   :  { %v4203_v7 = vsub.s32 %v2610_v6, %v3952_v8  ;;  %3519 = vmatprep.subr.bf16.mxu1 %v3518_v19 }
 0x315   :  { %v2664_v50 = vpop.permute.xlu1 %2663 }
 0x317   :  { %v3618_v21 = vpop.permute.xlu0 %3617 }
 0x318   :  { %v3620_v46 = vunpack.i.h.bf16 %v3618_v21  ;;  %v3619_v47 = vunpack.i.l.bf16 %v3618_v21 }
 0x31a   :  { %v2669_v51 = vsel %vm2667_vm1, %v3619_v47, %v2664_v50  ;;  %v2668_v52 = vsel %vm2667_vm1, %v3620_v46, %v3619_v47 }
 0x31b   :  { %v2666_v53 = vpop.permute.xlu0 %2665  ;;  %2739 = vmatprep.mubr.f32.mxu0 %v2669_v51 }
 0x31c   :  { %v2670_v55 = vsel %vm2667_vm1, %v2664_v50, %v2666_v53  ;;  %2740 = vmatmul.mubr.f32.vlgmr.msra.gmra.mrb[6].mxu0 %v2668_v52 }
 0x31d   :  { %3421 = vmatmul.mubr.msk.f32.vlgmr.msra.gmra.mrb[6].mxu1 %vm2457_vm13, %v2670_v55  ;;  %3529 = vmatpush1.bf16.xpose.msra.mxu0 %v3528_v26 }
 0x31e   :  { %3521 = vmatpush1.bf16.xpose.msra.mxu1 %v3520_v49  ;;  %3531 = vmatprep.subr.bf16.mxu0 %v3530_v36 }
 0x31f   :  { %3523 = vmatprep.subr.bf16.mxu1 %v3522_v32 }
 0x325   :  { %3533 = vmatpush1.bf16.xpose.msra.mxu0 %v3532_v45 }
 0x326   :  { %3525 = vmatpush1.bf16.xpose.msra.mxu1 %v3524_v41 }
 0x327   :  { %3534 = vmatprep.subr.bf16.mxu1 %v3657_v13 }
 0x37d   :  { %v3320_v56 = vpop.f32.mrb[2].mxu1 }
 0x37e   :  { %v3321_v63 = vpop.f32.mrb[3].mxu1 }
 0x37f   :  { %v3322_v2 = vadd.f32 %v3321_v63, %v3320_v56 }
 0x38f   :  { %v2601_v9 = vpop.f32.mrb[4].mxu1 }
 0x390   :  { %v2602_v10 = vadd.f32 %v3322_v2, %v2601_v9  ;;  %v3401_v11 = vpop.f32.mrb[5].mxu1 }
 0x392   :  { %v2614_v12 = vrot.slane %v2602_v10, %v4203_v7  ;;  %v2631_v14 = vcombine.high %v2602_v10, %v2602_v10  ;;  %2606 = vst.msk [vmem:[#allocation2] sm:$0x1] %vm2605_vm15, %v2602_v10 }
 0x394   :  { %v2638_v15 = vrot.slane %v2631_v14, %v4203_v7  ;;  %v3233_v60 = vrot.slane %v2614_v12, 9  ;;  %v2622_v62 = vcombine.high %v2614_v12, %v2614_v12  ;;  %v3051_v12 = vld [vmem:[%s4315_s5] sm:$0xff]  ;;  %v3052_v14 = vld [vmem:[%s4315_s5 + $0x8] sm:$0x3]  ;;  %s3662_s5 = smov [#allocation3]  }
 0x395   :  { %s3148_s29 = sshll.u32 %s3662_s5, 4  ;;  %s3149_s29 = int_to_ptr.vmem [resolvable:$true] %s3148_s29 }
 0x396   :  { %2617 = vrot.lane.b32.xlu1 %v3233_v60, %s3661_s28  ;;  %v3234_v61 = vrot.slane %v2622_v62, 9  ;;  %v2647_v0 = vcombine.high %v2638_v15, %v2638_v15  ;;  %2624 = vst.msk [vmem:[#allocation2 + $0x2] sm:$0x1] %vm2605_vm15, %v2622_v62  ;;  %2640 = vst.msk [vmem:[#allocation2 + $0x4] sm:$0x1] %vm2605_vm15, %v2638_v15  ;;  %v3235_v8 = vrot.slane %v2638_v15, 9  ;;  %v3535_v15 = vpack.c.bf16 %v3052_v14, %v3051_v12  ;;  %p3627_p1 = scmp.lt.s32.totalorder %s3149_s29, %s3149_s29 }
 0x398   :  { %2627 = vrot.lane.b32.xlu0 %v3234_v61, %s3661_s28  ;;  %2649 = vst.msk [vmem:[#allocation2 + $0x6] sm:$0x1] %vm2605_vm15, %v2647_v0  ;;  %v3236_v16 = vrot.slane %v2647_v0, 9 }
 0x39a   :  { %2643 = vrot.lane.b32.xlu1 %v3235_v8, %s3661_s28 }
 0x39c   :  { %2652 = vrot.lane.b32.xlu0 %v3236_v16, %s3661_s28 }
 0x3ef   :  { %v3365_v59 = vpop.f32.mrb[6].mxu0 }
 0x3f0   :  { %v3366_v5 = vpop.f32.mrb[7].mxu0  ;;  %v2811_v22 = vpop.f32.mrb[6].mxu1 }
 0x3f1   :  { %v3367_v57 = vadd.f32 %v3366_v5, %v3365_v59  ;;  %v3422_v25 = vpop.f32.mrb[7].mxu1 }
 0x3f3   :  { %v2812_v31 = vadd.f32 %v3367_v57, %v2811_v22 }
 0x3f5   :  { %v2823_v39 = vrot.slane %v2812_v31, %v4203_v7  ;;  %v2839_v40 = vcombine.high %v2812_v31, %v2812_v31  ;;  %2815 = vst.msk [vmem:[#allocation2 + $0x1] sm:$0x1] %vm2605_vm15, %v2812_v31 }
 0x3f7   :  { %v2846_v42 = vrot.slane %v2839_v40, %v4203_v7  ;;  %v3279_v43 = vrot.slane %v2823_v39, 9  ;;  %v2830_v44 = vcombine.high %v2823_v39, %v2823_v39 }
 0x3f9   :  { %2826 = vrot.lane.b32.xlu1 %v3279_v43, %s3661_s28  ;;  %v3280_v21 = vrot.slane %v2830_v44, 9  ;;  %v2855_v46 = vcombine.high %v2846_v42, %v2846_v42  ;;  %2832 = vst.msk [vmem:[#allocation2 + $0x3] sm:$0x1] %vm2605_vm15, %v2830_v44  ;;  %2848 = vst.msk [vmem:[#allocation2 + $0x5] sm:$0x1] %vm2605_vm15, %v2846_v42  ;;  %v3281_v47 = vrot.slane %v2846_v42, 9 }
 0x3fb   :  { %2835 = vrot.lane.b32.xlu0 %v3280_v21, %s3661_s28  ;;  %2857 = vst.msk [vmem:[#allocation2 + $0x7] sm:$0x1] %vm2605_vm15, %v2855_v46  ;;  %v3282_v50 = vrot.slane %v2855_v46, 9 }
 0x3fd   :  { %2851 = vrot.lane.b32.xlu1 %v3281_v47, %s3661_s28 }
 0x3ff   :  { %2860 = vrot.lane.b32.xlu0 %v3282_v50, %s3661_s28 }
 0x408   :  { %v2618_v51 = vpop.permute.xlu1 %2617 }
 0x409   :  { %2621 = vst.msk [vmem:[#allocation2] sm:$0x1] %vm2620_vm0, %v2618_v51 }
 0x40a   :  { %v2628_v52 = vpop.permute.xlu0 %2627 }
 0x40b   :  { %2630 = vst.msk [vmem:[#allocation2 + $0x2] sm:$0x1] %vm2620_vm0, %v2628_v52 }
 0x40c   :  { %v2644_v53 = vpop.permute.xlu1 %2643 }
 0x40d   :  { %2646 = vst.msk [vmem:[#allocation2 + $0x4] sm:$0x1] %vm2620_vm0, %v2644_v53 }
 0x40e   :  { %v2653_v13 = vpop.permute.xlu0 %2652 }
 0x40f   :  { %2655 = vst.msk [vmem:[#allocation2 + $0x6] sm:$0x1] %vm2620_vm0, %v2653_v13 }
 0x46b   :  { %v2827_v55 = vpop.permute.xlu1 %2826 }
 0x46c   :  { %2829 = vst.msk [vmem:[#allocation2 + $0x1] sm:$0x1] %vm2620_vm0, %v2827_v55 }
 0x46d   :  { %v2836_v56 = vpop.permute.xlu0 %2835 }
 0x46e   :  { %2838 = vst.msk [vmem:[#allocation2 + $0x3] sm:$0x1] %vm2620_vm0, %v2836_v56 }
 0x46f   :  { %v2852_v63 = vpop.permute.xlu1 %2851 }
 0x470   :  { %2854 = vst.msk [vmem:[#allocation2 + $0x5] sm:$0x1] %vm2620_vm0, %v2852_v63 }
 0x471   :  { %v2861_v2 = vpop.permute.xlu0 %2860 }
 0x472   :  { %2863 = vst.msk [vmem:[#allocation2 + $0x7] sm:$0x1] %vm2620_vm0, %v2861_v2 }
 0x479   :  { %v2864_v27 = vld [vmem:[#allocation2] sm:$0xff] }
 0x47a   :  { %v2896_v3 = vrot.slane %v2864_v27, %v4203_v7  ;;  %v2889_v6 = vcombine.high %v2864_v27, %v2864_v27 }
 0x47c   :  { %v2904_v9 = vcombine.high %v2896_v3, %v2896_v3  ;;  %v2903_v10 = vrot.slane %v2889_v6, %v4203_v7  ;;  %v3283_v7 = vld [vmem:[%s4314_s4] ss:$0 sm:$0xff]  ;;  %s3622_s4 = scalar_lea.vmem %s3149_s29, 32 }
 0x47d   :  { %p3623_p0 = scmp.ne.s32.totalorder %s3149_s29, %s3622_s4  ;;  %p3628_p2 = scmp.lt.s32.totalorder %s3622_s4, %s3622_s4 }
 0x47e   :  { %2974 = vmatprep.mubr.f32.mxu1 %v2904_v9  ;;  %v2905_v11 = vcombine.high %v2903_v10, %v2903_v10 }
 0x47f   :  { %2975 = vmatmul.mubr.f32.vlgmr.msra.gmra.mrb[8].mxu1 %v2896_v3  ;;  %p3629_p3 = por %p3628_p2, %p3627_p1 }
 0x480   :  { %3044 = vmatprep.mubr.f32.mxu0 %v2905_v11  ;;  %3427 = vmatprep.mubr.msk.f32.mxu1 %vm3659_vm3, %v3647_v4  ;;  %vm3140_vm3 = vcmask 74752  }
 0x481   :  { %3045 = vmatmul.mubr.f32.vlgmr.msra.gmra.mrb[8].mxu0 %v2903_v10  ;;  %3537 = vmatpush3.bf16.xpose.msk.msra.mxu1 %vm3536_vm4, %v3535_v15  ;;  %p3630_p4 = pnand %p3629_p3, %p3623_p0 }
 0x552   :  { %v2976_v60 = vpop.f32.mrb[8].mxu1 }
 0x553   :  { %v2977_v62 = vadd.f32 %v3283_v7, %v2976_v60  ;;  %v2978_v4 = vpop.f32.mrb[9].mxu1 }
 0x554   :  { %v3046_v61 = vpop.f32.mrb[8].mxu0 }
 0x555   :  { %v3047_v0 = vadd.f32 %v3046_v61, %v2977_v62  ;;  %v3048_v8 = vpop.f32.mrb[9].mxu0 }
 0x557   :  { %v3050_v16 = vmax.f32 %v3047_v0, 0.0 }
 0x559   :  { %3428 = vmatmul.mubr.msk.f32.vlgmr.msra.gmra.mrb[10].mxu1 %vm3060_vm2, %v3050_v16 }
 0x62c   :  { %v3136_v18 = vpop.f32.mrb[10].mxu1 }
 0x62d   :  { %v3137_v19 = vadd.f32 %v3284_v17, %v3136_v18  ;;  %v3429_v20 = vpop.f32.mrb[11].mxu1 }
 0x62f   :  { %3141 = vst.msk [vmem:[#allocation3] sm:$0x3] %vm3140_vm3, %v3137_v19 }
 0x630   :  { %3633 = shalt.err (!%p3630_p4)
}
 0x631   :  { %s3634_s9 = scalar_lea.hbm %s4317_s7, 32 }
 0x632   :  { %p3635_p5 = scmp.ne.s32.totalorder %s4317_s7, %s3634_s9  ;;  %p3638_p6 = scmp.lt.u32.totalorder %s3634_s9, %s4317_s7 }
 0x634   :  { %p3640_p7 = pnand %p3638_p6, %p3635_p5 }
 0x636   :  { %3643 = shalt.err (!%p3640_p7)
}
 0x637   :  { %3151 = dma.vmem_to_hbm [thread:$0]  %s3149_s29, 32, %s4317_s7, [#allocation4]  }
 0x638   :  { %3644 = dma.done.wait [#allocation4], 32  }
 0x639   :  { %3645 = vsyncadd [#allocation4], 4294967264 }
 0x63a   :  { %3155 = vsyncpa [#allocation4], 1 }

</bundles_post_ra>
